<compile_context>
chip_gen: v7x
topology: tpu7x:2x2x1
jax: 0.10.0
libtpu: 0.0.40
codegen_flags: <defaults>
</compile_context>

<pallas_src>
import jax
import jax.numpy as jnp
from jax.experimental import pallas as pl
from jax.experimental.pallas import tpu as pltpu


def _ceil_to(x, m):
    return ((x + m - 1) // m) * m


def _gcn_pallas(a_pad, x_pad, rin_col, rin_row, rout_col,
                w1, b1, w2, b2, w3, b3, *, n_real, tm, tk):
    """Fused tiled GCN forward.  Returns [1, hpad] (caller slices real lanes)."""
    npad = a_pad.shape[0]
    f_in_pad = x_pad.shape[1]
    hpad = w1.shape[1]
    ni = npad // tm
    nk = npad // tk
    inv_n = 1.0 / float(n_real)

    def kernel(a_ref, x_ref, rin_c_ref, rin_r_ref, rout_c_ref,
               w1_ref, b1_ref, w2_ref, b2_ref, w3_ref, b3_ref,
               o_ref,
               q_ref, feat_ref, s_ref, acc_ref):
        l = pl.program_id(0)      # 0: conv1, 1: conv2 (conv3 folded into readout)
        i = pl.program_id(1)      # A row tile
        k = pl.program_id(2)      # A column tile (reduction axis, innermost)

        koff = pl.multiple_of(k * tk, tk)
        ioff = pl.multiple_of(i * tm, tm)

        # -- once, at the very first grid step: zero the r_in^T A accumulator.
        @pl.when((l == 0) & (i == 0) & (k == 0))
        def _():
            s_ref[...] = jnp.zeros_like(s_ref)

        # -- once per (layer, k-chunk): materialize the projection chunk
        #    Q_l[koff:koff+tk] = (D_out^{-1/2} H_{l-1} W_l)[chunk] (bf16, resident).
        #    Layer-0 input X is pre-scaled by r_out in the wrapper; feat_ref
        #    stores r_out * H_l, so layer 1 needs no extra scaling either.
        @pl.when(i == 0)
        def _():
            @pl.when(l == 0)
            def _():
                q_ref[pl.ds(koff, tk), :] = jnp.dot(
                    x_ref[pl.ds(koff, tk), :], w1_ref[...],
                    preferred_element_type=jnp.float32).astype(jnp.bfloat16)

            @pl.when(l == 1)
            def _():
                q_ref[pl.ds(koff, tk), :] = jnp.dot(
                    feat_ref[pl.ds(koff, tk), :], w2_ref[...],
                    preferred_element_type=jnp.float32).astype(jnp.bfloat16)

        # -- aggregation: acc += A[i-tile, k-tile] @ Q_l[k-chunk]  (bf16 MXU, f32 acc)
        @pl.when(k == 0)
        def _():
            acc_ref[...] = jnp.zeros_like(acc_ref)

        a_tile = a_ref[...]                                        # [tm, tk] bf16 (raw 0/1)
        acc_ref[...] += jnp.dot(a_tile, q_ref[pl.ds(koff, tk), :],
                                preferred_element_type=jnp.float32)

        # -- while A is in VMEM (layer-1 sweep only): accumulate s = r_in^T A,
        #    i.e. the mean_nodes fold, up to the 1/N factor applied at the end.
        @pl.when(l == 0)
        def _():
            s_ref[k] += jnp.dot(rin_r_ref[...], a_tile,
                                preferred_element_type=jnp.float32)  # [1, tk]

        # -- layer epilogue at the last k-tile: H_l = relu(D_in^{-1/2} acc + b_l);
        #    store r_out * H_l (exactly what the next projection / readout needs).
        def _finalize(b_ref):
            h = jnp.maximum(acc_ref[...] * rin_c_ref[...] + b_ref[...], 0.0)
            feat_ref[pl.ds(ioff, tm), :] = (h * rout_c_ref[...]).astype(jnp.bfloat16)

        @pl.when((k == nk - 1) & (l == 0))
        def _():
            _finalize(b1_ref)

        @pl.when((k == nk - 1) & (l == 1))
        def _():
            _finalize(b2_ref)

        # -- final readout at the very last grid step:
        #    mean_nodes(A-hat H2 W3 + b3) = (1/N) (r_in^T A) (r_out*H2) W3 + b3.
        #    Valid only because conv3 has no activation.
        @pl.when((l == 1) & (i == ni - 1) & (k == nk - 1))
        def _():
            t = jnp.zeros((1, hpad), jnp.float32)
            for kc in range(nk):                                    # static unroll
                s_chunk = s_ref[kc].astype(jnp.bfloat16)            # [1, tk]
                f_chunk = feat_ref[kc * tk:(kc + 1) * tk, :]        # [tk, hpad] bf16
                t = t + jnp.dot(s_chunk, f_chunk,
                                preferred_element_type=jnp.float32)
            out = jnp.dot(t.astype(jnp.bfloat16), w3_ref[...],
                          preferred_element_type=jnp.float32)       # [1, hpad]
            o_ref[...] = out * inv_n + b3_ref[...]

    # ---- generation-aware budgets --------------------------------------------
    bf16, f32 = 2, 4
    vmem_est = (
        2 * tm * tk * bf16                                 # A tile, double-buffered
        + 2 * npad * f_in_pad * bf16                       # resident X (conservative x2)
        + 2 * npad * hpad * bf16                           # q + feat scratch
        + tm * hpad * f32                                  # accumulator
        + nk * 8 * tk * f32                                # s chunks (sublane-padded)
        + 2 * (f_in_pad * hpad + 2 * hpad * hpad) * bf16   # weights
        + 2 * (2 * tm + 2 * npad) * f32                    # degree vectors
        + 8 * hpad * f32                                   # biases + output
        + (1 << 20)                                        # slack
    )
    # fits v7x's 64 MiB physical VMEM for realistic N; v5e/v6e have 128 MiB.
    vmem_limit = int(min(128 * 2**20, max(32 * 2**20, 2 * vmem_est)))

    flops = int(
        2 * (2 * npad * npad * hpad)                       # two A @ Q aggregations
        + 2 * npad * npad                                  # s = r_in^T A
        + 2 * npad * (f_in_pad + hpad) * hpad              # Q1, Q2 projections
        + 2 * npad * hpad + 2 * hpad * hpad                # readout GEMVs
    )
    bytes_accessed = int(
        2 * npad * npad * bf16                             # A streamed twice (bf16)
        + npad * f_in_pad * bf16
        + (f_in_pad * hpad + 2 * hpad * hpad) * bf16
        + npad * (2 * f32 + bf16) + 8 * hpad * f32
    )

    return pl.pallas_call(
        kernel,
        out_shape=jax.ShapeDtypeStruct((1, hpad), jnp.float32),
        grid=(2, ni, nk),
        in_specs=[
            pl.BlockSpec((tm, tk), lambda l, i, k: (i, k)),           # raw A (bf16)
            pl.BlockSpec((npad, f_in_pad), lambda l, i, k: (0, 0)),   # r_out * X (bf16)
            pl.BlockSpec((tm, 1), lambda l, i, k: (i, 0)),            # r_in column (f32)
            pl.BlockSpec((1, tm), lambda l, i, k: (0, i)),            # r_in row (bf16)
            pl.BlockSpec((tm, 1), lambda l, i, k: (i, 0)),            # r_out column (f32)
            pl.BlockSpec((f_in_pad, hpad), lambda l, i, k: (0, 0)),   # W1 (bf16)
            pl.BlockSpec((1, hpad), lambda l, i, k: (0, 0)),          # b1 (f32)
            pl.BlockSpec((hpad, hpad), lambda l, i, k: (0, 0)),       # W2 (bf16)
            pl.BlockSpec((1, hpad), lambda l, i, k: (0, 0)),          # b2 (f32)
            pl.BlockSpec((hpad, hpad), lambda l, i, k: (0, 0)),       # W3 (bf16)
            pl.BlockSpec((1, hpad), lambda l, i, k: (0, 0)),          # b3 (f32)
        ],
        out_specs=pl.BlockSpec((1, hpad), lambda l, i, k: (0, 0)),
        scratch_shapes=[
            pltpu.VMEM((npad, hpad), jnp.bfloat16),    # q:    Q_l chunks
            pltpu.VMEM((npad, hpad), jnp.bfloat16),    # feat: r_out * H_l
            pltpu.VMEM((nk, 1, tk), jnp.float32),      # s:    r_in^T A chunks
            pltpu.VMEM((tm, hpad), jnp.float32),       # acc:  per-row-tile f32 accumulator
        ],
        compiler_params=pltpu.CompilerParams(
            # Row tiles share feat/s scratch across iterations, so the row axis
            # must stay "arbitrary" (see megacore TODO at the top of the file).
            dimension_semantics=("arbitrary", "arbitrary", "arbitrary"),
            vmem_limit_bytes=vmem_limit,
        ),
        cost_estimate=pl.CostEstimate(flops=flops, transcendentals=0,
                                      bytes_accessed=bytes_accessed),
    )(a_pad, x_pad, rin_col, rin_row, rout_col, w1, b1, w2, b2, w3, b3)


@jax.jit
def gcn_forward(params, adj, x):
    """TPU forward of GCN.forward(g): 3x GraphConv(norm='both') + ReLU + mean_nodes."""
    n = adj.shape[0]
    in_feats = x.shape[1]
    h1 = params["w1"].shape[1]
    h2 = params["w2"].shape[1]
    f3 = params["w3"].shape[1]

    # degree^{-1/2} (DGL norm='both', zero degrees clamped to 1).  The wrapper's
    # only O(N^2) work is these two reductions plus the zero-pad/bf16 cast of
    # the *raw* adjacency below; the normalized A-hat is never materialized and
    # mean_rows(A-hat) is accumulated inside the kernel.
    a32 = adj.astype(jnp.float32)
    r_in = jax.lax.rsqrt(jnp.maximum(jnp.sum(a32, axis=1), 1.0))    # dst in-degree
    r_out = jax.lax.rsqrt(jnp.maximum(jnp.sum(a32, axis=0), 1.0))   # src out-degree

    # TPU-friendly padded shapes: A tiled, all feature dims padded to 128 lanes.
    npad = _ceil_to(max(n, 128), 128)
    tm = 256 if npad % 256 == 0 else 128                                  # A row tile
    tk = 512 if npad % 512 == 0 else (256 if npad % 256 == 0 else 128)    # A col tile
    f_in_pad = _ceil_to(in_feats, 128)
    hpad = _ceil_to(max(h1, h2, f3), 128)

    # TODO(synk): callers holding a tile-aligned bf16 adjacency can skip this
    # pad/cast (the last remaining wrapper pass over an N^2 tensor).
    a_pad = jnp.pad(adj.astype(jnp.bfloat16), ((0, npad - n), (0, npad - n)))

    # pre-scale X by r_out so the layer-1 projection needs no in-kernel scaling
    xs = (r_out[:, None] * x.astype(jnp.float32)).astype(jnp.bfloat16)
    x_pad = jnp.pad(xs, ((0, npad - n), (0, f_in_pad - in_feats)))

    rin_pad = jnp.pad(r_in, (0, npad - n), constant_values=1.0)
    rout_pad = jnp.pad(r_out, (0, npad - n), constant_values=1.0)
    rin_col = rin_pad.reshape(npad, 1)
    rin_row = rin_pad.astype(jnp.bfloat16).reshape(1, npad)
    rout_col = rout_pad.reshape(npad, 1)

    def pad_w(w, rows, cols):
        w = w.astype(jnp.bfloat16)
        return jnp.pad(w, ((0, rows - w.shape[0]), (0, cols - w.shape[1])))

    def pad_b(b):
        return jnp.pad(b.astype(jnp.float32), (0, hpad - b.shape[0])).reshape(1, hpad)

    out_pad = _gcn_pallas(
        a_pad, x_pad, rin_col, rin_row, rout_col,
        pad_w(params["w1"], f_in_pad, hpad), pad_b(params["b1"]),
        pad_w(params["w2"], hpad, hpad), pad_b(params["b2"]),
        pad_w(params["w3"], hpad, hpad), pad_b(params["b3"]),
        n_real=n, tm=tm, tk=tk)
    return out_pad[:, :f3]                                   # [1, h_feats2]


def init_params(key, in_feats, h_feats, h_feats2):
    """Xavier-uniform weights, zero biases (matches DGL GraphConv init)."""
    k1, k2, k3 = jax.random.split(key, 3)

    def glorot(k, fan_in, fan_out):
        limit = jnp.sqrt(6.0 / (fan_in + fan_out))
        return jax.random.uniform(k, (fan_in, fan_out), jnp.float32,
                                  minval=-limit, maxval=limit)

    h_mid = h_feats // 2
    return {
        "w1": glorot(k1, in_feats, h_feats),
        "b1": jnp.zeros((h_feats,), jnp.float32),
        "w2": glorot(k2, h_feats, h_mid),
        "b2": jnp.zeros((h_mid,), jnp.float32),
        "w3": glorot(k3, h_mid, h_feats2),
        "b3": jnp.zeros((h_feats2,), jnp.float32),
    }


def normalize_adj(adj):
    """A-hat = D_in^{-1/2} A D_out^{-1/2}, degrees clamped >= 1 (DGL norm='both')."""
    adj = adj.astype(jnp.float32)
    deg_in = jnp.maximum(adj.sum(axis=1), 1.0)
    deg_out = jnp.maximum(adj.sum(axis=0), 1.0)
    return (deg_in ** -0.5)[:, None] * adj * (deg_out ** -0.5)[None, :]


@jax.jit
def gcn_reference(params, adj, x):
    """Pure-JAX f32 reference of the DGL forward (tolerance check)."""
    a_hat = normalize_adj(adj)
    x = x.astype(jnp.float32)
    h = jnp.maximum(a_hat @ (x @ params["w1"]) + params["b1"], 0.0)
    h = jnp.maximum(a_hat @ (h @ params["w2"]) + params["b2"], 0.0)
    h = a_hat @ (h @ params["w3"]) + params["b3"]
    return jnp.mean(h, axis=0, keepdims=True)


if __name__ == "__main__":
    key = jax.random.PRNGKey(0)
    k_adj, k_x, k_par, k_b1, k_b2, k_b3 = jax.random.split(key, 6)

    num_nodes = 300                       # pads to 384 -> grid (2, 3, 3): exercises tiling
    in_feats, h_feats, h_feats2 = 32, 16, 8

    # random directed graph: adj[v, u] = 1 iff edge u -> v
    adj = jax.random.bernoulli(k_adj, p=0.05, shape=(num_nodes, num_nodes))
    adj = adj.astype(jnp.float32)

    # node embeddings g.ndata['embedding']
    x = jax.random.normal(k_x, (num_nodes, in_feats), dtype=jnp.float32)

    params = init_params(k_par, in_feats, h_feats, h_feats2)
    # non-zero biases (DGL inits them to zero; trained models won't be) to
    # exercise the bias / padding / mean-fold paths for real.
    params["b1"] = 0.1 * jax.random.normal(k_b1, params["b1"].shape, jnp.float32)
    params["b2"] = 0.1 * jax.random.normal(k_b2, params["b2"].shape, jnp.float32)
    params["b3"] = 0.1 * jax.random.normal(k_b3, params["b3"].shape, jnp.float32)

    out = gcn_forward(params, adj, x)
    jax.block_until_ready(out)
    assert out.shape == (1, h_feats2), out.shape

    ref = gcn_reference(params, adj, x)
    jax.block_until_ready(ref)
    # bf16 MXU operands (f32 accumulation) across 3 chained layers -> loose tol
    assert jnp.allclose(out, ref, rtol=5e-2, atol=5e-2), (out, ref)

    print("KERNEL_OK")
</pallas_src>

<mosaic_0001>
module attributes {stable_mosaic.version = 11 : i64} {
  func.func @kernel(%arg0: i32, %arg1: i32, %arg2: i32, %arg3: memref<128x128xbf16, #tpu.memory_space<vmem>>, %arg4: memref<384x128xbf16, #tpu.memory_space<vmem>>, %arg5: memref<128x1xf32, #tpu.memory_space<vmem>>, %arg6: memref<1x128xbf16, #tpu.memory_space<vmem>>, %arg7: memref<128x1xf32, #tpu.memory_space<vmem>>, %arg8: memref<128x128xbf16, #tpu.memory_space<vmem>>, %arg9: memref<1x128xf32, #tpu.memory_space<vmem>>, %arg10: memref<128x128xbf16, #tpu.memory_space<vmem>>, %arg11: memref<1x128xf32, #tpu.memory_space<vmem>>, %arg12: memref<128x128xbf16, #tpu.memory_space<vmem>>, %arg13: memref<1x128xf32, #tpu.memory_space<vmem>>, %arg14: memref<1x128xf32, #tpu.memory_space<vmem>>, %arg15: memref<384x128xbf16, #tpu.memory_space<vmem>>, %arg16: memref<384x128xbf16, #tpu.memory_space<vmem>>, %arg17: memref<3x1x128xf32, #tpu.memory_space<vmem>>, %arg18: memref<128x128xf32, #tpu.memory_space<vmem>>) attributes {dimension_semantics = [#tpu.dimension_semantics<arbitrary>, #tpu.dimension_semantics<arbitrary>, #tpu.dimension_semantics<arbitrary>], iteration_bounds = array<i64: 2, 3, 3>, scalar_prefetch = 0 : i64, scratch_operands = 4 : i64, tpu.core_type = #tpu.core_type<tc>, window_params = [{transform_indices = @transform_0, window_bounds = array<i64: 128, 128>}, {pipeline_mode = #tpu.pipeline_mode<synchronous>, transform_indices = @transform_1, window_bounds = array<i64: 384, 128>}, {transform_indices = @transform_2, window_bounds = array<i64: 128, 1>}, {transform_indices = @transform_3, window_bounds = array<i64: 1, 128>}, {transform_indices = @transform_4, window_bounds = array<i64: 128, 1>}, {pipeline_mode = #tpu.pipeline_mode<synchronous>, transform_indices = @transform_5, window_bounds = array<i64: 128, 128>}, {pipeline_mode = #tpu.pipeline_mode<synchronous>, transform_indices = @transform_6, window_bounds = array<i64: 1, 128>}, {pipeline_mode = #tpu.pipeline_mode<synchronous>, transform_indices = @transform_7, window_bounds = array<i64: 128, 128>}, {pipeline_mode = #tpu.pipeline_mode<synchronous>, transform_indices = @transform_8, window_bounds = array<i64: 1, 128>}, {pipeline_mode = #tpu.pipeline_mode<synchronous>, transform_indices = @transform_9, window_bounds = array<i64: 128, 128>}, {pipeline_mode = #tpu.pipeline_mode<synchronous>, transform_indices = @transform_10, window_bounds = array<i64: 1, 128>}, {pipeline_mode = #tpu.pipeline_mode<synchronous>, transform_indices = @transform_11, window_bounds = array<i64: 1, 128>}]} {
    %c128_i32 = arith.constant 128 : i32
    %0 = arith.muli %arg2, %c128_i32 : i32
    %1 = tpu.assume_multiple %0, 128 : i32
    %c128_i32_0 = arith.constant 128 : i32
    %2 = arith.muli %arg1, %c128_i32_0 : i32
    %3 = tpu.assume_multiple %2, 128 : i32
    %c0_i32 = arith.constant 0 : i32
    %4 = arith.cmpi eq, %arg0, %c0_i32 : i32
    %c0_i32_1 = arith.constant 0 : i32
    %5 = arith.cmpi eq, %arg1, %c0_i32_1 : i32
    %6 = arith.andi %4, %5 : i1
    %c0_i32_2 = arith.constant 0 : i32
    %7 = arith.cmpi eq, %arg2, %c0_i32_2 : i32
    %8 = arith.andi %6, %7 : i1
    %9 = arith.extui %8 : i1 to i32
    %c0_i32_3 = arith.constant 0 : i32
    %10 = arith.cmpi ne, %9, %c0_i32_3 : i32
    scf.if %10 {
      %cst_24 = arith.constant 0.000000e+00 : f32
      %44 = vector.broadcast %cst_24 : f32 to vector<3x1x128xf32>
      %c0_25 = arith.constant 0 : index
      %c0_26 = arith.constant 0 : index
      %c0_27 = arith.constant 0 : index
      %45 = vector.load %arg17[%c0_25, %c0_26, %c0_27] : memref<3x1x128xf32, #tpu.memory_space<vmem>>, vector<3x1x128xf32>
      tpu.vector_store %arg17[%c0_25, %c0_26, %c0_27], %44 {strides = array<i32>} : memref<3x1x128xf32, #tpu.memory_space<vmem>>, vector<3x1x128xf32>,
    } else {
    }
    %c0_i32_4 = arith.constant 0 : i32
    %11 = arith.cmpi eq, %arg1, %c0_i32_4 : i32
    %12 = arith.extui %11 : i1 to i32
    %c0_i32_5 = arith.constant 0 : i32
    %13 = arith.cmpi ne, %12, %c0_i32_5 : i32
    scf.if %13 {
      %c0_i32_24 = arith.constant 0 : i32
      %44 = arith.cmpi eq, %arg0, %c0_i32_24 : i32
      %45 = arith.extui %44 : i1 to i32
      %c0_i32_25 = arith.constant 0 : i32
      %46 = arith.cmpi ne, %45, %c0_i32_25 : i32
      scf.if %46 {
        %50 = arith.index_cast %1 : i32 to index
        %c0_28 = arith.constant 0 : index
        %51 = vector.load %arg4[%50, %c0_28] : memref<384x128xbf16, #tpu.memory_space<vmem>>, vector<128x128xbf16>
        %c0_29 = arith.constant 0 : index
        %c0_30 = arith.constant 0 : index
        %52 = vector.load %arg8[%c0_29, %c0_30] : memref<128x128xbf16, #tpu.memory_space<vmem>>, vector<128x128xbf16>
        %cst_31 = arith.constant dense<0.000000e+00> : vector<128x128xf32>
        %53 = tpu.matmul %51, %52, %cst_31 {dimension_numbers = #tpu.dot_dimension_numbers<[1], [0], [0], [1], [0, 0, 1, 1], [], []>} : vector<128x128xbf16>, vector<128x128xbf16>, vector<128x128xf32> -> vector<128x128xf32>
        %54 = arith.truncf %53 : vector<128x128xf32> to vector<128x128xbf16>
        %55 = arith.index_cast %1 : i32 to index
        %c0_32 = arith.constant 0 : index
        %56 = vector.load %arg15[%55, %c0_32] : memref<384x128xbf16, #tpu.memory_space<vmem>>, vector<128x128xbf16>
        tpu.vector_store %arg15[%55, %c0_32], %54 {strides = array<i32>} : memref<384x128xbf16, #tpu.memory_space<vmem>>, vector<128x128xbf16>,
      } else {
      }
      %c1_i32_26 = arith.constant 1 : i32
      %47 = arith.cmpi eq, %arg0, %c1_i32_26 : i32
      %48 = arith.extui %47 : i1 to i32
      %c0_i32_27 = arith.constant 0 : i32
      %49 = arith.cmpi ne, %48, %c0_i32_27 : i32
      scf.if %49 {
        %50 = arith.index_cast %1 : i32 to index
        %c0_28 = arith.constant 0 : index
        %51 = vector.load %arg16[%50, %c0_28] : memref<384x128xbf16, #tpu.memory_space<vmem>>, vector<128x128xbf16>
        %c0_29 = arith.constant 0 : index
        %c0_30 = arith.constant 0 : index
        %52 = vector.load %arg10[%c0_29, %c0_30] : memref<128x128xbf16, #tpu.memory_space<vmem>>, vector<128x128xbf16>
        %cst_31 = arith.constant dense<0.000000e+00> : vector<128x128xf32>
        %53 = tpu.matmul %51, %52, %cst_31 {dimension_numbers = #tpu.dot_dimension_numbers<[1], [0], [0], [1], [0, 0, 1, 1], [], []>} : vector<128x128xbf16>, vector<128x128xbf16>, vector<128x128xf32> -> vector<128x128xf32>
        %54 = arith.truncf %53 : vector<128x128xf32> to vector<128x128xbf16>
        %55 = arith.index_cast %1 : i32 to index
        %c0_32 = arith.constant 0 : index
        %56 = vector.load %arg15[%55, %c0_32] : memref<384x128xbf16, #tpu.memory_space<vmem>>, vector<128x128xbf16>
        tpu.vector_store %arg15[%55, %c0_32], %54 {strides = array<i32>} : memref<384x128xbf16, #tpu.memory_space<vmem>>, vector<128x128xbf16>,
      } else {
      }
    } else {
    }
    %c0_i32_6 = arith.constant 0 : i32
    %14 = arith.cmpi eq, %arg2, %c0_i32_6 : i32
    %15 = arith.extui %14 : i1 to i32
    %c0_i32_7 = arith.constant 0 : i32
    %16 = arith.cmpi ne, %15, %c0_i32_7 : i32
    scf.if %16 {
      %cst_24 = arith.constant 0.000000e+00 : f32
      %44 = vector.broadcast %cst_24 : f32 to vector<128x128xf32>
      %c0_25 = arith.constant 0 : index
      %c0_26 = arith.constant 0 : index
      %45 = vector.load %arg18[%c0_25, %c0_26] : memref<128x128xf32, #tpu.memory_space<vmem>>, vector<128x128xf32>
      tpu.vector_store %arg18[%c0_25, %c0_26], %44 {strides = array<i32>} : memref<128x128xf32, #tpu.memory_space<vmem>>, vector<128x128xf32>,
    } else {
    }
    %c0 = arith.constant 0 : index
    %c0_8 = arith.constant 0 : index
    %17 = vector.load %arg3[%c0, %c0_8] : memref<128x128xbf16, #tpu.memory_space<vmem>>, vector<128x128xbf16>
    %c0_9 = arith.constant 0 : index
    %c0_10 = arith.constant 0 : index
    %18 = vector.load %arg18[%c0_9, %c0_10] : memref<128x128xf32, #tpu.memory_space<vmem>>, vector<128x128xf32>
    %19 = arith.index_cast %1 : i32 to index
    %c0_11 = arith.constant 0 : index
    %20 = vector.load %arg15[%19, %c0_11] : memref<384x128xbf16, #tpu.memory_space<vmem>>, vector<128x128xbf16>
    %cst = arith.constant dense<0.000000e+00> : vector<128x128xf32>
    %21 = tpu.matmul %17, %20, %cst {dimension_numbers = #tpu.dot_dimension_numbers<[1], [0], [0], [1], [0, 0, 1, 1], [], []>} : vector<128x128xbf16>, vector<128x128xbf16>, vector<128x128xf32> -> vector<128x128xf32>
    %22 = arith.addf %18, %21 : vector<128x128xf32>
    %c0_12 = arith.constant 0 : index
    %c0_13 = arith.constant 0 : index
    %23 = vector.load %arg18[%c0_12, %c0_13] : memref<128x128xf32, #tpu.memory_space<vmem>>, vector<128x128xf32>
    tpu.vector_store %arg18[%c0_12, %c0_13], %22 {strides = array<i32>} : memref<128x128xf32, #tpu.memory_space<vmem>>, vector<128x128xf32>,
    %c0_i32_14 = arith.constant 0 : i32
    %24 = arith.cmpi eq, %arg0, %c0_i32_14 : i32
    %25 = arith.extui %24 : i1 to i32
    %c0_i32_15 = arith.constant 0 : i32
    %26 = arith.cmpi ne, %25, %c0_i32_15 : i32
    scf.if %26 {
      %44 = arith.index_cast %arg2 : i32 to index
      %c0_24 = arith.constant 0 : index
      %c0_25 = arith.constant 0 : index
      %45 = vector.load %arg17[%44, %c0_24, %c0_25] : memref<3x1x128xf32, #tpu.memory_space<vmem>>, vector<1x1x128xf32>
      %46 = vector.shape_cast %45 : vector<1x1x128xf32> to vector<1x128xf32>
      %c0_26 = arith.constant 0 : index
      %c0_27 = arith.constant 0 : index
      %47 = vector.load %arg6[%c0_26, %c0_27] : memref<1x128xbf16, #tpu.memory_space<vmem>>, vector<1x128xbf16>
      %cst_28 = arith.constant dense<0.000000e+00> : vector<1x128xf32>
      %48 = tpu.matmul %47, %17, %cst_28 {dimension_numbers = #tpu.dot_dimension_numbers<[1], [0], [0], [1], [0, 0, 1, 1], [], []>} : vector<1x128xbf16>, vector<128x128xbf16>, vector<1x128xf32> -> vector<1x128xf32>
      %49 = arith.addf %46, %48 : vector<1x128xf32>
      %50 = arith.index_cast %arg2 : i32 to index
      %c0_29 = arith.constant 0 : index
      %c0_30 = arith.constant 0 : index
      %51 = vector.load %arg17[%50, %c0_29, %c0_30] : memref<3x1x128xf32, #tpu.memory_space<vmem>>, vector<1x1x128xf32>
      %52 = vector.shape_cast %51 : vector<1x1x128xf32> to vector<1x128xf32>
      %53 = vector.shape_cast %49 : vector<1x128xf32> to vector<1x1x128xf32>
      tpu.vector_store %arg17[%50, %c0_29, %c0_30], %53 {strides = array<i32>} : memref<3x1x128xf32, #tpu.memory_space<vmem>>, vector<1x1x128xf32>,
    } else {
    }
    %c2_i32 = arith.constant 2 : i32
    %27 = arith.cmpi eq, %arg2, %c2_i32 : i32
    %c0_i32_16 = arith.constant 0 : i32
    %28 = arith.cmpi eq, %arg0, %c0_i32_16 : i32
    %29 = arith.andi %27, %28 : i1
    %30 = arith.extui %29 : i1 to i32
    %c0_i32_17 = arith.constant 0 : i32
    %31 = arith.cmpi ne, %30, %c0_i32_17 : i32
    scf.if %31 {
      %c0_24 = arith.constant 0 : index
      %c0_25 = arith.constant 0 : index
      %44 = vector.load %arg18[%c0_24, %c0_25] : memref<128x128xf32, #tpu.memory_space<vmem>>, vector<128x128xf32>
      %c0_26 = arith.constant 0 : index
      %c0_27 = arith.constant 0 : index
      %45 = vector.load %arg5[%c0_26, %c0_27] : memref<128x1xf32, #tpu.memory_space<vmem>>, vector<128x1xf32>
      %46 = vector.broadcast %45 : vector<128x1xf32> to vector<128x128xf32>
      %47 = arith.mulf %44, %46 : vector<128x128xf32>
      %c0_28 = arith.constant 0 : index
      %c0_29 = arith.constant 0 : index
      %48 = vector.load %arg9[%c0_28, %c0_29] : memref<1x128xf32, #tpu.memory_space<vmem>>, vector<1x128xf32>
      %49 = vector.broadcast %48 : vector<1x128xf32> to vector<128x128xf32>
      %50 = arith.addf %47, %49 : vector<128x128xf32>
      %cst_30 = arith.constant 0.000000e+00 : f32
      %51 = vector.broadcast %cst_30 : f32 to vector<128x128xf32>
      %52 = arith.maximumf %50, %51 : vector<128x128xf32>
      %c0_31 = arith.constant 0 : index
      %c0_32 = arith.constant 0 : index
      %53 = vector.load %arg7[%c0_31, %c0_32] : memref<128x1xf32, #tpu.memory_space<vmem>>, vector<128x1xf32>
      %54 = vector.broadcast %53 : vector<128x1xf32> to vector<128x128xf32>
      %55 = arith.mulf %52, %54 : vector<128x128xf32>
      %56 = arith.truncf %55 : vector<128x128xf32> to vector<128x128xbf16>
      %57 = arith.index_cast %3 : i32 to index
      %c0_33 = arith.constant 0 : index
      %58 = vector.load %arg16[%57, %c0_33] : memref<384x128xbf16, #tpu.memory_space<vmem>>, vector<128x128xbf16>
      tpu.vector_store %arg16[%57, %c0_33], %56 {strides = array<i32>} : memref<384x128xbf16, #tpu.memory_space<vmem>>, vector<128x128xbf16>,
    } else {
    }
    %c2_i32_18 = arith.constant 2 : i32
    %32 = arith.cmpi eq, %arg2, %c2_i32_18 : i32
    %c1_i32 = arith.constant 1 : i32
    %33 = arith.cmpi eq, %arg0, %c1_i32 : i32
    %34 = arith.andi %32, %33 : i1
    %35 = arith.extui %34 : i1 to i32
    %c0_i32_19 = arith.constant 0 : i32
    %36 = arith.cmpi ne, %35, %c0_i32_19 : i32
    scf.if %36 {
      %c0_24 = arith.constant 0 : index
      %c0_25 = arith.constant 0 : index
      %44 = vector.load %arg18[%c0_24, %c0_25] : memref<128x128xf32, #tpu.memory_space<vmem>>, vector<128x128xf32>
      %c0_26 = arith.constant 0 : index
      %c0_27 = arith.constant 0 : index
      %45 = vector.load %arg5[%c0_26, %c0_27] : memref<128x1xf32, #tpu.memory_space<vmem>>, vector<128x1xf32>
      %46 = vector.broadcast %45 : vector<128x1xf32> to vector<128x128xf32>
      %47 = arith.mulf %44, %46 : vector<128x128xf32>
      %c0_28 = arith.constant 0 : index
      %c0_29 = arith.constant 0 : index
      %48 = vector.load %arg11[%c0_28, %c0_29] : memref<1x128xf32, #tpu.memory_space<vmem>>, vector<1x128xf32>
      %49 = vector.broadcast %48 : vector<1x128xf32> to vector<128x128xf32>
      %50 = arith.addf %47, %49 : vector<128x128xf32>
      %cst_30 = arith.constant 0.000000e+00 : f32
      %51 = vector.broadcast %cst_30 : f32 to vector<128x128xf32>
      %52 = arith.maximumf %50, %51 : vector<128x128xf32>
      %c0_31 = arith.constant 0 : index
      %c0_32 = arith.constant 0 : index
      %53 = vector.load %arg7[%c0_31, %c0_32] : memref<128x1xf32, #tpu.memory_space<vmem>>, vector<128x1xf32>
      %54 = vector.broadcast %53 : vector<128x1xf32> to vector<128x128xf32>
      %55 = arith.mulf %52, %54 : vector<128x128xf32>
      %56 = arith.truncf %55 : vector<128x128xf32> to vector<128x128xbf16>
      %57 = arith.index_cast %3 : i32 to index
      %c0_33 = arith.constant 0 : index
      %58 = vector.load %arg16[%57, %c0_33] : memref<384x128xbf16, #tpu.memory_space<vmem>>, vector<128x128xbf16>
      tpu.vector_store %arg16[%57, %c0_33], %56 {strides = array<i32>} : memref<384x128xbf16, #tpu.memory_space<vmem>>, vector<128x128xbf16>,
    } else {
    }
    %c1_i32_20 = arith.constant 1 : i32
    %37 = arith.cmpi eq, %arg0, %c1_i32_20 : i32
    %c2_i32_21 = arith.constant 2 : i32
    %38 = arith.cmpi eq, %arg1, %c2_i32_21 : i32
    %39 = arith.andi %37, %38 : i1
    %c2_i32_22 = arith.constant 2 : i32
    %40 = arith.cmpi eq, %arg2, %c2_i32_22 : i32
    %41 = arith.andi %39, %40 : i1
    %42 = arith.extui %41 : i1 to i32
    %c0_i32_23 = arith.constant 0 : i32
    %43 = arith.cmpi ne, %42, %c0_i32_23 : i32
    scf.if %43 {
      %cst_24 = arith.constant 0.000000e+00 : f32
      %44 = vector.broadcast %cst_24 : f32 to vector<1x128xf32>
      %c0_25 = arith.constant 0 : index
      %c0_26 = arith.constant 0 : index
      %c0_27 = arith.constant 0 : index
      %45 = vector.load %arg17[%c0_25, %c0_26, %c0_27] : memref<3x1x128xf32, #tpu.memory_space<vmem>>, vector<1x1x128xf32>
      %46 = vector.shape_cast %45 : vector<1x1x128xf32> to vector<1x128xf32>
      %47 = arith.truncf %46 : vector<1x128xf32> to vector<1x128xbf16>
      %c0_28 = arith.constant 0 : index
      %c0_29 = arith.constant 0 : index
      %48 = vector.load %arg16[%c0_28, %c0_29] : memref<384x128xbf16, #tpu.memory_space<vmem>>, vector<128x128xbf16>
      %cst_30 = arith.constant dense<0.000000e+00> : vector<1x128xf32>
      %49 = tpu.matmul %47, %48, %cst_30 {dimension_numbers = #tpu.dot_dimension_numbers<[1], [0], [0], [1], [0, 0, 1, 1], [], []>} : vector<1x128xbf16>, vector<128x128xbf16>, vector<1x128xf32> -> vector<1x128xf32>
      %50 = arith.addf %44, %49 : vector<1x128xf32>
      %c1 = arith.constant 1 : index
      %c0_31 = arith.constant 0 : index
      %c0_32 = arith.constant 0 : index
      %51 = vector.load %arg17[%c1, %c0_31, %c0_32] : memref<3x1x128xf32, #tpu.memory_space<vmem>>, vector<1x1x128xf32>
      %52 = vector.shape_cast %51 : vector<1x1x128xf32> to vector<1x128xf32>
      %53 = arith.truncf %52 : vector<1x128xf32> to vector<1x128xbf16>
      %c128 = arith.constant 128 : index
      %c0_33 = arith.constant 0 : index
      %54 = vector.load %arg16[%c128, %c0_33] : memref<384x128xbf16, #tpu.memory_space<vmem>>, vector<128x128xbf16>
      %cst_34 = arith.constant dense<0.000000e+00> : vector<1x128xf32>
      %55 = tpu.matmul %53, %54, %cst_34 {dimension_numbers = #tpu.dot_dimension_numbers<[1], [0], [0], [1], [0, 0, 1, 1], [], []>} : vector<1x128xbf16>, vector<128x128xbf16>, vector<1x128xf32> -> vector<1x128xf32>
      %56 = arith.addf %50, %55 : vector<1x128xf32>
      %c2 = arith.constant 2 : index
      %c0_35 = arith.constant 0 : index
      %c0_36 = arith.constant 0 : index
      %57 = vector.load %arg17[%c2, %c0_35, %c0_36] : memref<3x1x128xf32, #tpu.memory_space<vmem>>, vector<1x1x128xf32>
      %58 = vector.shape_cast %57 : vector<1x1x128xf32> to vector<1x128xf32>
      %59 = arith.truncf %58 : vector<1x128xf32> to vector<1x128xbf16>
      %c256 = arith.constant 256 : index
      %c0_37 = arith.constant 0 : index
      %60 = vector.load %arg16[%c256, %c0_37] : memref<384x128xbf16, #tpu.memory_space<vmem>>, vector<128x128xbf16>
      %cst_38 = arith.constant dense<0.000000e+00> : vector<1x128xf32>
      %61 = tpu.matmul %59, %60, %cst_38 {dimension_numbers = #tpu.dot_dimension_numbers<[1], [0], [0], [1], [0, 0, 1, 1], [], []>} : vector<1x128xbf16>, vector<128x128xbf16>, vector<1x128xf32> -> vector<1x128xf32>
      %62 = arith.addf %56, %61 : vector<1x128xf32>
      %63 = arith.truncf %62 : vector<1x128xf32> to vector<1x128xbf16>
      %c0_39 = arith.constant 0 : index
      %c0_40 = arith.constant 0 : index
      %64 = vector.load %arg12[%c0_39, %c0_40] : memref<128x128xbf16, #tpu.memory_space<vmem>>, vector<128x128xbf16>
      %cst_41 = arith.constant dense<0.000000e+00> : vector<1x128xf32>
      %65 = tpu.matmul %63, %64, %cst_41 {dimension_numbers = #tpu.dot_dimension_numbers<[1], [0], [0], [1], [0, 0, 1, 1], [], []>} : vector<1x128xbf16>, vector<128x128xbf16>, vector<1x128xf32> -> vector<1x128xf32>
      %cst_42 = arith.constant 0.00333333341 : f32
      %66 = vector.broadcast %cst_42 : f32 to vector<1x128xf32>
      %67 = arith.mulf %65, %66 : vector<1x128xf32>
      %c0_43 = arith.constant 0 : index
      %c0_44 = arith.constant 0 : index
      %68 = vector.load %arg13[%c0_43, %c0_44] : memref<1x128xf32, #tpu.memory_space<vmem>>, vector<1x128xf32>
      %69 = arith.addf %67, %68 : vector<1x128xf32>
      %c0_45 = arith.constant 0 : index
      %c0_46 = arith.constant 0 : index
      %70 = vector.load %arg14[%c0_45, %c0_46] : memref<1x128xf32, #tpu.memory_space<vmem>>, vector<1x128xf32>
      tpu.vector_store %arg14[%c0_45, %c0_46], %69 {strides = array<i32>} : memref<1x128xf32, #tpu.memory_space<vmem>>, vector<1x128xf32>,
    } else {
    }
    return
  }
  func.func @transform_0(%arg0: i32, %arg1: i32, %arg2: i32) -> (i32, i32) {
    %c0_i32 = arith.constant 0 : i32
    return %arg1, %arg2 : i32, i32
  }
  func.func @transform_1(%arg0: i32, %arg1: i32, %arg2: i32) -> (i32, i32) {
    %c0_i32 = arith.constant 0 : i32
    %c0_i32_0 = arith.constant 0 : i32
    %c0_i32_1 = arith.constant 0 : i32
    return %c0_i32, %c0_i32_0 : i32, i32
  }
  func.func @transform_2(%arg0: i32, %arg1: i32, %arg2: i32) -> (i32, i32) {
    %c0_i32 = arith.constant 0 : i32
    %c0_i32_0 = arith.constant 0 : i32
    return %arg1, %c0_i32 : i32, i32
  }
  func.func @transform_3(%arg0: i32, %arg1: i32, %arg2: i32) -> (i32, i32) {
    %c0_i32 = arith.constant 0 : i32
    %c0_i32_0 = arith.constant 0 : i32
    return %c0_i32, %arg1 : i32, i32
  }
  func.func @transform_4(%arg0: i32, %arg1: i32, %arg2: i32) -> (i32, i32) {
    %c0_i32 = arith.constant 0 : i32
    %c0_i32_0 = arith.constant 0 : i32
    return %arg1, %c0_i32 : i32, i32
  }
  func.func @transform_5(%arg0: i32, %arg1: i32, %arg2: i32) -> (i32, i32) {
    %c0_i32 = arith.constant 0 : i32
    %c0_i32_0 = arith.constant 0 : i32
    %c0_i32_1 = arith.constant 0 : i32
    return %c0_i32, %c0_i32_0 : i32, i32
  }
  func.func @transform_6(%arg0: i32, %arg1: i32, %arg2: i32) -> (i32, i32) {
    %c0_i32 = arith.constant 0 : i32
    %c0_i32_0 = arith.constant 0 : i32
    %c0_i32_1 = arith.constant 0 : i32
    return %c0_i32, %c0_i32_0 : i32, i32
  }
  func.func @transform_7(%arg0: i32, %arg1: i32, %arg2: i32) -> (i32, i32) {
    %c0_i32 = arith.constant 0 : i32
    %c0_i32_0 = arith.constant 0 : i32
    %c0_i32_1 = arith.constant 0 : i32
    return %c0_i32, %c0_i32_0 : i32, i32
  }
  func.func @transform_8(%arg0: i32, %arg1: i32, %arg2: i32) -> (i32, i32) {
    %c0_i32 = arith.constant 0 : i32
    %c0_i32_0 = arith.constant 0 : i32
    %c0_i32_1 = arith.constant 0 : i32
    return %c0_i32, %c0_i32_0 : i32, i32
  }
  func.func @transform_9(%arg0: i32, %arg1: i32, %arg2: i32) -> (i32, i32) {
    %c0_i32 = arith.constant 0 : i32
    %c0_i32_0 = arith.constant 0 : i32
    %c0_i32_1 = arith.constant 0 : i32
    return %c0_i32, %c0_i32_0 : i32, i32
  }
  func.func @transform_10(%arg0: i32, %arg1: i32, %arg2: i32) -> (i32, i32) {
    %c0_i32 = arith.constant 0 : i32
    %c0_i32_0 = arith.constant 0 : i32
    %c0_i32_1 = arith.constant 0 : i32
    return %c0_i32, %c0_i32_0 : i32, i32
  }
  func.func @transform_11(%arg0: i32, %arg1: i32, %arg2: i32) -> (i32, i32) {
    %c0_i32 = arith.constant 0 : i32
    %c0_i32_0 = arith.constant 0 : i32
    %c0_i32_1 = arith.constant 0 : i32
    return %c0_i32, %c0_i32_0 : i32, i32
  }
}

</mosaic_0001>

<bundles_post_ra>
// kernel: gcn_forward.1
= control target key start
LH: loop header
LB: loop body
LE: loop exit
PB: predicated region body
PF: predicated region fallthrough
CT: control target
= control target key end

     0   :  { %s3582_s0 = inlined_call_operand.vmem [shape: bf16[384,384], index: 0, kind: input, shape index: {}]   ;;  %s3583_s1 = inlined_call_operand.vmem [shape: bf16[384,128], index: 1, kind: input, shape index: {}]   ;;  %s3584_s2 = inlined_call_operand.vmem [shape: f32[384,1], index: 2, kind: input, shape index: {}]   ;;  %s3585_s3 = inlined_call_operand.vmem [shape: bf16[1,384], index: 3, kind: input, shape index: {}]   ;;  %s3586_s4 = inlined_call_operand.vmem [shape: f32[384,1], index: 4, kind: input, shape index: {}]   ;;  %s3587_s5 = inlined_call_operand.vmem [shape: bf16[128,128], index: 5, kind: input, shape index: {}]   ;;  %s3588_s6 = inlined_call_operand.vmem [shape: f32[1,128], index: 6, kind: input, shape index: {}]   ;;  %s3589_s7 = inlined_call_operand.vmem [shape: bf16[128,128], index: 7, kind: input, shape index: {}]   ;;  %s3590_s8 = inlined_call_operand.vmem [shape: f32[1,128], index: 8, kind: input, shape index: {}]   ;;  %s3591_s9 = inlined_call_operand.vmem [shape: bf16[128,128], index: 9, kind: input, shape index: {}]   ;;  %s3592_s10 = inlined_call_operand.vmem [shape: f32[1,128], index: 10, kind: input, shape index: {}]   ;;  %s3593_s11 = inlined_call_operand.hbm [shape: f32[1,128], index: 11, kind: output, shape index: {}]  }
   0x1   :  { %3599 = sst [smem:[#allocation15_spill]] %s3582_s0 }
   0x2   :  { %3600 = sst [smem:[#allocation16_spill]] %s3592_s10 }
   0x3   :  { %3601 = sst [smem:[#allocation17_spill]] %s3593_s11 }
   0x4   :  { %16 = vsyncpa [#allocation8], 0  ;;  %s3025_s17 = smov 0   ;;  %s3027_s18 = smov 0  }
   0x5   :  { %s3029_s19 = smov 0   ;;  %s3031_s20 = smov 0  }
   0x6   :  { %s3033_s21 = smov 0   ;;  %s3035_s22 = smov 0  }
   0x7   :  { %s3037_s23 = smov 0   ;;  %s3039_s24 = smov 0  }
   0x8   :  { %s3041_s25 = smov 0  }
   0x9 LB: > { %3602 = sst [smem:[#allocation10_spill]] %s2946_s23  ;;  %s34_s27 = sadd.s32 1, %s2942_s22  ;;  %s2954_s25 = sphi %s3041_s25, %s22_s25   ;;  %s2950_s24 = sphi %s3039_s24, %s3623_s24   ;;  %s2946_s23 = sphi %s3037_s23, %s3617_s23   ;;  %s2942_s22 = sphi %s3035_s22, %s3622_s22   ;;  %s2938_s21 = sphi %s3033_s21, %s3615_s21   ;;  %s2934_s20 = sphi %s3031_s20, %s3614_s20   ;;  %s2930_s19 = sphi %s3029_s19, %s3621_s19   ;;  %s2926_s18 = sphi %s3027_s18, %s3620_s18   ;;  %s2922_s17 = sphi %s3025_s17, %s3619_s17  }
   0xa   : > { %3603 = sst [smem:[#allocation11_spill]] %s2950_s24  ;;  %p35_p0 = scmp.ge.s32.totalorder %s34_s27, 3 }
   0xb   : > { %s37_s28 = sadd.s32 1, %s2946_s23  ;;  %s41_s29 = sadd.s32 1, %s2950_s24 }
   0xc   : > { %s3625_s27 = smov (%p35_p0, %s34_s27), 0  ;;  %s3627_s28 = smov (!%p35_p0, %s37_s28), %s2946_s23 }
   0xd   : > { %3604 = sst [smem:[#allocation12_spill]] %s3625_s27  ;;  %p57_p1 = scmp.ne.s32.totalorder %s2926_s18, %s2922_s17 }
   0xe   : > { %p39_p2 = scmp.ge.s32.totalorder %s3627_s28, 3  ;;  %p58_p3 = scmp.eq.s32.totalorder %s2954_s25, 0 }
   0xf   : > { %s46_s30 = ssub.s32 %s2942_s22, %s3625_s27  ;;  %s50_s12 = sadd.s32 1, %s2926_s18 }
  0x10   : > { %s3629_s28 = smov (%p39_p2, %s3627_s28), 0  ;;  %s3631_s29 = smov (!%p39_p2, %s41_s29), %s2950_s24 }
  0x11   : > { %3605 = sst [smem:[#allocation13_spill]] %s3629_s28  ;;  %s45_s13 = ssub.s32 %s2946_s23, %s3629_s28 }
  0x12   : > { %p59_p4 = por %p58_p3, %p57_p1  ;;  %p43_p5 = scmp.ge.s32.totalorder %s3631_s29, 2 }
  0x13   : > { %s47_s14 = sor.u32 %s46_s30, %s45_s13  ;;  %p2309_p7 = scmp.ge.s32.totalorder %s2954_s25, 18 }
  0x14   : > { %p48_p6 = scmp.eq.s32.totalorder %s47_s14, 0  ;;  %s3633_s29 = smov (%p43_p5, %s3631_s29), 0 }
  0x15   : > { %3606 = sst [smem:[#allocation14_spill]] %s3633_s29  ;;  %350 = sbr.rel (%p2309_p7) target bundleno = 48 (0x30), region = 44 }
  0x16   : > { %s3091_s15 = scalar_select %p48_p6, %s2926_s18, %s50_s12  }
  0x1c   : > { %353 = sbr.rel (!%p59_p4) target bundleno = 48 (0x30), region = 48  ;;  %s355_s16 = sand.u32 (%p59_p4), 1, %s2926_s18  }
  0x1d   : > { %s2722_s26 = smul.u32 (%p59_p4), 48, %s2946_s23  ;;  %s2310_s27 = sshll.u32 (%p59_p4), %s355_s16, 6 }
  0x1e   : > { %s3607_s0 = sld [smem:[#allocation15_spill]] (%p59_p4)  ;;  %s357_s12 = scalar_lea.vmem (%p59_p4), [#allocation6], %s2310_s27 }
  0x1f   : > { %s360_s24 = sadd.s32 (%p59_p4), %s2942_s22, %s2722_s26 }
  0x20   : > { %s2313_s28 = sshll.u32 (%p59_p4), %s360_s24, 2 }
  0x24   : > { %s3100_s30 = scalar_lea.vmem %s3607_s0, %s2313_s28 }
  0x25   : > { %v378_v0 = vld [vmem:[%s3100_s30] sm:$0xf]  ;;  %v380_v1 = vld [vmem:[%s3100_s30 + $0xc] sm:$0xf]  ;;  %v382_v2 = vld [vmem:[%s3100_s30 + $0x18] sm:$0xf] }
  0x26   : > { %379 = vst [vmem:[%s357_s12] sm:$0xf] %v378_v0  ;;  %381 = vst [vmem:[%s357_s12 + $0x4] sm:$0xf] %v380_v1  ;;  %v384_v3 = vld [vmem:[%s3100_s30 + $0x24] sm:$0xf] }
  0x27   : > { %383 = vst [vmem:[%s357_s12 + $0x8] sm:$0xf] %v382_v2  ;;  %v386_v4 = vld [vmem:[%s3100_s30 + $0x30] sm:$0xf]  ;;  %v388_v5 = vld [vmem:[%s3100_s30 + $0x3c] sm:$0xf] }
  0x28   : > { %385 = vst [vmem:[%s357_s12 + $0xc] sm:$0xf] %v384_v3  ;;  %387 = vst [vmem:[%s357_s12 + $0x10] sm:$0xf] %v386_v4  ;;  %v390_v6 = vld [vmem:[%s3100_s30 + $0x48] sm:$0xf] }
  0x29   : > { %389 = vst [vmem:[%s357_s12 + $0x14] sm:$0xf] %v388_v5  ;;  %v392_v7 = vld [vmem:[%s3100_s30 + $0x54] sm:$0xf]  ;;  %v394_v8 = vld [vmem:[%s3100_s30 + $0x60] sm:$0xf] }
  0x2a   : > { %391 = vst [vmem:[%s357_s12 + $0x18] sm:$0xf] %v390_v6  ;;  %393 = vst [vmem:[%s357_s12 + $0x1c] sm:$0xf] %v392_v7  ;;  %v396_v9 = vld [vmem:[%s3100_s30 + $0x6c] sm:$0xf] }
  0x2b   : > { %395 = vst [vmem:[%s357_s12 + $0x20] sm:$0xf] %v394_v8  ;;  %v398_v10 = vld [vmem:[%s3100_s30 + $0x78] sm:$0xf]  ;;  %v400_v11 = vld [vmem:[%s3100_s30 + $0x84] sm:$0xf] }
  0x2c   : > { %397 = vst [vmem:[%s357_s12 + $0x24] sm:$0xf] %v396_v9  ;;  %399 = vst [vmem:[%s357_s12 + $0x28] sm:$0xf] %v398_v10  ;;  %v402_v12 = vld [vmem:[%s3100_s30 + $0x90] sm:$0xf] }
  0x2d   : > { %401 = vst [vmem:[%s357_s12 + $0x2c] sm:$0xf] %v400_v11  ;;  %v404_v13 = vld [vmem:[%s3100_s30 + $0x9c] sm:$0xf]  ;;  %v406_v14 = vld [vmem:[%s3100_s30 + $0xa8] sm:$0xf] }
  0x2e   : > { %403 = vst [vmem:[%s357_s12 + $0x30] sm:$0xf] %v402_v12  ;;  %405 = vst [vmem:[%s357_s12 + $0x34] sm:$0xf] %v404_v13  ;;  %v408_v15 = vld [vmem:[%s3100_s30 + $0xb4] sm:$0xf] }
  0x2f   : > { %407 = vst [vmem:[%s357_s12 + $0x38] sm:$0xf] %v406_v14  ;;  %409 = vst [vmem:[%s357_s12 + $0x3c] sm:$0xf] %v408_v15 }
  0x30 PF: > { %p2314_p8 = scmp.ge.s32.totalorder %s2954_s25, 1  ;;  %p487_p9 = scmp.lt.s32.totalorder %s2954_s25, 19 }
  0x32   : > { %p488_p10 = pnand %p2314_p8, %p487_p9 }
  0x33   : > { %s494_s10 = sand.u32 (!%p488_p10), 1, %s2922_s17   ;;  %s2316_s11 = sshll.u32 (!%p488_p10), %s2934_s20, 4 }
  0x34   : > { %491 = sbr.rel (%p488_p10) target bundleno = 2006 (0x7d6), region = 101  ;;  %s2315_s24 = sshll.u32 (!%p488_p10), %s494_s10, 6 }
  0x35   : > { %p543_p11 = scmp.lt.s32.totalorder (!%p488_p10), %s2316_s11, 47  ;;  %p548_p12 = scmp.lt.s32.totalorder (!%p488_p10), %s2934_s20, 2 }
  0x36   : > { %s3127_s28 = sshll.u32 (!%p488_p10), %s2930_s19, 7  ;;  %p560_p13 = scmp.eq.s32.totalorder (!%p488_p10), %s2938_s21, 0 }
  0x37   : > { %p561_p0 = scmp.eq.s32.totalorder (!%p488_p10), %s2934_s20, 0  ;;  %p564_p2 = scmp.eq.s32.totalorder (!%p488_p10), %s2930_s19, 0 }
  0x39   : > { %p562_p1 = pnand (!%p488_p10), %p561_p0, %p560_p13 }
  0x3b   : > { %s3635_s11 = smov (!%p543_p11, %s2316_s11), 47  ;;  %p563_p3 = pneg %p562_p1 }
  0x3c   : > { %s3124_s26 = scalar_select %p548_p12, %s2934_s20, 2 }
  0x3d   : > { %s2317_s27 = sshll.u32 %s3635_s11, 3  ;;  %p565_p4 = pnand %p564_p2, %p563_p3 }
  0x3e   : > { %s3132_s16 = scalar_lea.vmem %s3584_s2, %s2317_s27  ;;  %s550_s17 = scalar_lea.vmem %s3585_s3, %s3124_s26  ;;  %v2956_v16 = vmov (!%p565_p4), 0.0  }
  0x3f   : > { %s3141_s29 = scalar_lea.vmem %s3586_s4, %s2317_s27  ;;  %s3149_s11 = scalar_lea.vmem [#allocation6], %s2315_s24  ;;  %569 = vst [vmem:[#allocation4] sm:$0x1] (!%p565_p4), %v2956_v16  ;;  %570 = vst [vmem:[#allocation4 + $0x1] sm:$0x1] (!%p565_p4), %v2956_v16 }
  0x40   : > { %568 = sbr.rel (%p565_p4) target bundleno = 71 (0x47), region = 109  ;;  %571 = vst [vmem:[#allocation4 + $0x2] sm:$0x1] (!%p565_p4), %v2956_v16 }
  0x47 PF: > { %p2322_p5 = scmp.ne.s32.totalorder %s2934_s20, 0 }
  0x48   : > { %p2323_p6 = scmp.ne.s32.totalorder (!%p2322_p5), %s2938_s21, 0 }
  0x49   : > { %574 = sbr.rel (%p2322_p5) target bundleno = 599 (0x257), region = 113 }
  0x50   : > { %577 = sbr.rel (%p2323_p6) target bundleno = 339 (0x153), region = 117  ;;  %v2810_v17 = vld [vmem:[%s3587_s5] sm:$0xff] (!%p2323_p6)   ;;  %s578_s13 = sshra.s32 (!%p2323_p6), %s3127_s28, 3  ;;  %v2811_v18 = vld [vmem:[%s3587_s5 + $0x8] sm:$0xff] (!%p2323_p6)   ;;  %v2812_v19 = vld [vmem:[%s3587_s5 + $0x10] sm:$0xff] (!%p2323_p6)  }
  0x51   : > { %2473 = vmatprep.subr.bf16.mxu0 (!%p2323_p6), %v2810_v17  ;;  %2669 = vmatprep.subr.bf16.mxu1 (!%p2323_p6), %v2810_v17  ;;  %s2324_s30 = sshll.u32 (!%p2323_p6), %s578_s13, 2  ;;  %v2813_v20 = vld [vmem:[%s3587_s5 + $0x18] sm:$0xff] (!%p2323_p6)   ;;  %v2814_v23 = vld [vmem:[%s3587_s5 + $0x20] sm:$0xff] (!%p2323_p6)   ;;  %v2815_v24 = vld [vmem:[%s3587_s5 + $0x28] sm:$0xff] (!%p2323_p6)   ;;  %s815_s23 = sshra.s32 (!%p2323_p6), %s3127_s28, 4 }
  0x52   : > { %2474 = vmatpush3.bf16.msra.mxu0 (!%p2323_p6), %v2810_v17  ;;  %2677 = vmatpush3.bf16.msra.mxu1 (!%p2323_p6), %v2810_v17  ;;  %s3166_s27 = scalar_lea.vmem (!%p2323_p6), %s3583_s1, %s2324_s30  ;;  %v2816_v25 = vld [vmem:[%s3587_s5 + $0x30] sm:$0xff] (!%p2323_p6)   ;;  %v2817_v26 = vld [vmem:[%s3587_s5 + $0x38] sm:$0xff] (!%p2323_p6)   ;;  %s2341_s13 = sshll.u32 (!%p2323_p6), %s815_s23, 3 }
  0x53   : > { %2475 = vmatprep.subr.bf16.mxu0 (!%p2323_p6), %v2811_v18  ;;  %2670 = vmatprep.subr.bf16.mxu1 (!%p2323_p6), %v2811_v18  ;;  %v2818_v21 = vld [vmem:[%s3166_s27] sm:$0xff] (!%p2323_p6)   ;;  %v2820_v27 = vld [vmem:[%s3166_s27 + $0x8] sm:$0xff] (!%p2323_p6)   ;;  %v2822_v29 = vld [vmem:[%s3166_s27 + $0x10] sm:$0xff] (!%p2323_p6)   ;;  %s818_s30 = scalar_lea.vmem (!%p2323_p6), [#allocation2], %s2341_s13 }
  0x54   : > { %v2819_v22 = vld [vmem:[%s3166_s27 + $0x20] sm:$0xff] (!%p2323_p6)   ;;  %2489 = vmatprep.mubr.bf16.mxu0 (!%p2323_p6), %v2818_v21  ;;  %v2821_v28 = vld [vmem:[%s3166_s27 + $0x28] sm:$0xff] (!%p2323_p6)   ;;  %v2823_v30 = vld [vmem:[%s3166_s27 + $0x30] sm:$0xff] (!%p2323_p6)  }
  0x55   : > { %2497 = vmatprep.mubr.bf16.mxu1 (!%p2323_p6), %v2819_v22  ;;  %v2824_v31 = vld [vmem:[%s3166_s27 + $0x18] sm:$0xff] (!%p2323_p6)  }
  0x56   : > { %2476 = vmatpush3.bf16.msra.mxu0 (!%p2323_p6), %v2811_v18  ;;  %2678 = vmatpush3.bf16.msra.mxu1 (!%p2323_p6), %v2811_v18  ;;  %v2825_v32 = vld [vmem:[%s3166_s27 + $0x38] sm:$0xff] (!%p2323_p6)  }
  0x57   : > { %2477 = vmatprep.subr.bf16.mxu0 %v2812_v19  ;;  %2671 = vmatprep.subr.bf16.mxu1 %v2812_v19 }
  0x5a   : > { %2478 = vmatpush3.bf16.msra.mxu0 %v2812_v19  ;;  %2679 = vmatpush3.bf16.msra.mxu1 %v2812_v19 }
  0x5b   : > { %2479 = vmatprep.subr.bf16.mxu0 %v2813_v20  ;;  %2672 = vmatprep.subr.bf16.mxu1 %v2813_v20 }
  0x5e   : > { %2480 = vmatpush3.bf16.msra.mxu0 %v2813_v20  ;;  %2680 = vmatpush3.bf16.msra.mxu1 %v2813_v20 }
  0x5f   : > { %2481 = vmatprep.subr.bf16.mxu0 %v2814_v23  ;;  %2673 = vmatprep.subr.bf16.mxu1 %v2814_v23 }
  0x62   : > { %2482 = vmatpush3.bf16.msra.mxu0 %v2814_v23  ;;  %2681 = vmatpush3.bf16.msra.mxu1 %v2814_v23 }
  0x63   : > { %2483 = vmatprep.subr.bf16.mxu0 %v2815_v24  ;;  %2674 = vmatprep.subr.bf16.mxu1 %v2815_v24 }
  0x66   : > { %2484 = vmatpush3.bf16.msra.mxu0 %v2815_v24  ;;  %2682 = vmatpush3.bf16.msra.mxu1 %v2815_v24 }
  0x67   : > { %2485 = vmatprep.subr.bf16.mxu0 %v2816_v25  ;;  %2675 = vmatprep.subr.bf16.mxu1 %v2816_v25 }
  0x6a   : > { %2486 = vmatpush3.bf16.msra.mxu0 %v2816_v25  ;;  %2683 = vmatpush3.bf16.msra.mxu1 %v2816_v25 }
  0x6b   : > { %2487 = vmatprep.subr.bf16.mxu0 %v2817_v26  ;;  %2676 = vmatprep.subr.bf16.mxu1 %v2817_v26 }
  0x6e   : > { %2488 = vmatpush3.bf16.msra.mxu0 %v2817_v26  ;;  %2684 = vmatpush3.bf16.msra.mxu1 %v2817_v26 }
  0x71   : > { %2490 = vmatmul.mubr.bf16.vlgmr.msra.gmra.mrb[0].mxu0 %v2820_v27  ;;  %2498 = vmatmul.mubr.bf16.vlgmr.msra.gmra.mrb[0].mxu1 %v2821_v28 }
  0x72   : > { %2493 = vmatprep.mubr.bf16.mxu0 %v2822_v29  ;;  %2501 = vmatprep.mubr.bf16.mxu1 %v2823_v30 }
  0x79   : > { %2494 = vmatmul.mubr.bf16.gmra.mrb[4].mxu0 %v2824_v31  ;;  %2502 = vmatmul.mubr.bf16.gmra.mrb[4].mxu1 %v2825_v32 }
 0x144   : > { %v2491_v33 = vpop.f32.mrb[0].mxu0  ;;  %v2499_v34 = vpop.f32.mrb[0].mxu1 }
 0x145   : > { %v744_v35 = vpop.f32.mrb[1].mxu0  ;;  %v776_v36 = vpop.f32.mrb[1].mxu1 }
 0x146   : > { %v2492_v37 = vpop.f32.mrb[2].mxu0  ;;  %v2500_v38 = vpop.f32.mrb[2].mxu1 }
 0x147   : > { %v808_v39 = vpack.c.bf16 %v2492_v37, %v2491_v33  ;;  %v812_v40 = vpack.c.bf16 %v2500_v38, %v2499_v34  ;;  %v747_v41 = vpop.f32.mrb[3].mxu0  ;;  %v779_v42 = vpop.f32.mrb[3].mxu1 }
 0x148   : > { %v807_v43 = vpack.c.bf16 %v747_v41, %v744_v35  ;;  %v811_v44 = vpack.c.bf16 %v779_v42, %v776_v36 }
 0x149   : > { %820 = vst [vmem:[%s818_s30 + $0x8] sm:$0xff] %v808_v39  ;;  %824 = vst [vmem:[%s818_s30 + $0x28] sm:$0xff] %v812_v40 }
 0x14a   : > { %819 = vst [vmem:[%s818_s30] sm:$0xff] %v807_v43  ;;  %823 = vst [vmem:[%s818_s30 + $0x20] sm:$0xff] %v811_v44 }
 0x14c   : > { %v2495_v45 = vpop.f32.mrb[4].mxu0  ;;  %v2503_v46 = vpop.f32.mrb[4].mxu1 }
 0x14d   : > { %v760_v47 = vpop.f32.mrb[5].mxu0  ;;  %v792_v48 = vpop.f32.mrb[5].mxu1 }
 0x14e   : > { %v2496_v49 = vpop.f32.mrb[6].mxu0  ;;  %v2504_v50 = vpop.f32.mrb[6].mxu1 }
 0x14f   : > { %v810_v51 = vpack.c.bf16 %v2496_v49, %v2495_v45  ;;  %v814_v52 = vpack.c.bf16 %v2504_v50, %v2503_v46  ;;  %v763_v53 = vpop.f32.mrb[7].mxu0  ;;  %v795_v54 = vpop.f32.mrb[7].mxu1 }
 0x150   : > { %v809_v55 = vpack.c.bf16 %v763_v53, %v760_v47  ;;  %v813_v56 = vpack.c.bf16 %v795_v54, %v792_v48 }
 0x151   : > { %822 = vst [vmem:[%s818_s30 + $0x18] sm:$0xff] %v810_v51  ;;  %826 = vst [vmem:[%s818_s30 + $0x38] sm:$0xff] %v814_v52 }
 0x152   : > { %821 = vst [vmem:[%s818_s30 + $0x10] sm:$0xff] %v809_v55  ;;  %825 = vst [vmem:[%s818_s30 + $0x30] sm:$0xff] %v813_v56 }
 0x153 PF: > { %p2342_p7 = scmp.ne.s32.totalorder %s2938_s21, 1 }
 0x154   : > { %v2826_v57 = vld [vmem:[%s3589_s7] sm:$0xff] (!%p2342_p7)   ;;  %s831_s10 = sshra.s32 (!%p2342_p7), %s3127_s28, 4  ;;  %v2827_v58 = vld [vmem:[%s3589_s7 + $0x8] sm:$0xff] (!%p2342_p7)   ;;  %v2828_v59 = vld [vmem:[%s3589_s7 + $0x10] sm:$0xff] (!%p2342_p7)  }
 0x155   : > { %830 = sbr.rel (%p2342_p7) target bundleno = 599 (0x257), region = 121  ;;  %2505 = vmatprep.subr.bf16.mxu0 (!%p2342_p7), %v2826_v57  ;;  %2685 = vmatprep.subr.bf16.mxu1 (!%p2342_p7), %v2826_v57  ;;  %s3200_s14 = sshll.u32 (!%p2342_p7), %s831_s10, 3  ;;  %v2829_v60 = vld [vmem:[%s3589_s7 + $0x18] sm:$0xff] (!%p2342_p7)   ;;  %v2830_v63 = vld [vmem:[%s3589_s7 + $0x20] sm:$0xff] (!%p2342_p7)   ;;  %v2831_v0 = vld [vmem:[%s3589_s7 + $0x28] sm:$0xff] (!%p2342_p7)  }
 0x156   : > { %2506 = vmatpush3.bf16.msra.mxu0 (!%p2342_p7), %v2826_v57  ;;  %2693 = vmatpush3.bf16.msra.mxu1 (!%p2342_p7), %v2826_v57  ;;  %s3209_s12 = scalar_lea.vmem (!%p2342_p7), [#allocation3], %s3200_s14  ;;  %v2832_v1 = vld [vmem:[%s3589_s7 + $0x30] sm:$0xff] (!%p2342_p7)   ;;  %v2833_v2 = vld [vmem:[%s3589_s7 + $0x38] sm:$0xff] (!%p2342_p7)   ;;  %s1013_s0 = scalar_lea.vmem (!%p2342_p7), [#allocation2], %s3200_s14 }
 0x157   : > { %2507 = vmatprep.subr.bf16.mxu0 (!%p2342_p7), %v2827_v58  ;;  %2686 = vmatprep.subr.bf16.mxu1 (!%p2342_p7), %v2827_v58  ;;  %v835_v61 = vld [vmem:[%s3209_s12] sm:$0xff] (!%p2342_p7)  ;;  %v836_v3 = vld [vmem:[%s3209_s12 + $0x8] sm:$0xff] (!%p2342_p7)  ;;  %v837_v5 = vld [vmem:[%s3209_s12 + $0x10] sm:$0xff] (!%p2342_p7) }
 0x158   : > { %v839_v62 = vld [vmem:[%s3209_s12 + $0x20] sm:$0xff] (!%p2342_p7)  ;;  %2521 = vmatprep.mubr.bf16.mxu0 (!%p2342_p7), %v835_v61  ;;  %v840_v4 = vld [vmem:[%s3209_s12 + $0x28] sm:$0xff] (!%p2342_p7)  ;;  %v841_v6 = vld [vmem:[%s3209_s12 + $0x30] sm:$0xff] (!%p2342_p7) }
 0x159   : > { %2529 = vmatprep.mubr.bf16.mxu1 (!%p2342_p7), %v839_v62  ;;  %v838_v7 = vld [vmem:[%s3209_s12 + $0x18] sm:$0xff] (!%p2342_p7) }
 0x15a   : > { %2508 = vmatpush3.bf16.msra.mxu0 (!%p2342_p7), %v2827_v58  ;;  %2694 = vmatpush3.bf16.msra.mxu1 (!%p2342_p7), %v2827_v58  ;;  %v842_v8 = vld [vmem:[%s3209_s12 + $0x38] sm:$0xff] (!%p2342_p7) }
 0x15b   : > { %2509 = vmatprep.subr.bf16.mxu0 (!%p2342_p7), %v2828_v59  ;;  %2687 = vmatprep.subr.bf16.mxu1 (!%p2342_p7), %v2828_v59 }
 0x15e   : > { %2510 = vmatpush3.bf16.msra.mxu0 %v2828_v59  ;;  %2695 = vmatpush3.bf16.msra.mxu1 %v2828_v59 }
 0x15f   : > { %2511 = vmatprep.subr.bf16.mxu0 %v2829_v60  ;;  %2688 = vmatprep.subr.bf16.mxu1 %v2829_v60 }
 0x162   : > { %2512 = vmatpush3.bf16.msra.mxu0 %v2829_v60  ;;  %2696 = vmatpush3.bf16.msra.mxu1 %v2829_v60 }
 0x163   : > { %2513 = vmatprep.subr.bf16.mxu0 %v2830_v63  ;;  %2689 = vmatprep.subr.bf16.mxu1 %v2830_v63 }
 0x166   : > { %2514 = vmatpush3.bf16.msra.mxu0 %v2830_v63  ;;  %2697 = vmatpush3.bf16.msra.mxu1 %v2830_v63 }
 0x167   : > { %2515 = vmatprep.subr.bf16.mxu0 %v2831_v0  ;;  %2690 = vmatprep.subr.bf16.mxu1 %v2831_v0 }
 0x16a   : > { %2516 = vmatpush3.bf16.msra.mxu0 %v2831_v0  ;;  %2698 = vmatpush3.bf16.msra.mxu1 %v2831_v0 }
 0x16b   : > { %2517 = vmatprep.subr.bf16.mxu0 %v2832_v1  ;;  %2691 = vmatprep.subr.bf16.mxu1 %v2832_v1 }
 0x16e   : > { %2518 = vmatpush3.bf16.msra.mxu0 %v2832_v1  ;;  %2699 = vmatpush3.bf16.msra.mxu1 %v2832_v1 }
 0x16f   : > { %2519 = vmatprep.subr.bf16.mxu0 %v2833_v2  ;;  %2692 = vmatprep.subr.bf16.mxu1 %v2833_v2 }
 0x172   : > { %2520 = vmatpush3.bf16.msra.mxu0 %v2833_v2  ;;  %2700 = vmatpush3.bf16.msra.mxu1 %v2833_v2 }
 0x175   : > { %2522 = vmatmul.mubr.bf16.vlgmr.msra.gmra.mrb[0].mxu0 %v836_v3  ;;  %2530 = vmatmul.mubr.bf16.vlgmr.msra.gmra.mrb[0].mxu1 %v840_v4 }
 0x176   : > { %2525 = vmatprep.mubr.bf16.mxu0 %v837_v5  ;;  %2533 = vmatprep.mubr.bf16.mxu1 %v841_v6 }
 0x17d   : > { %2526 = vmatmul.mubr.bf16.gmra.mrb[4].mxu0 %v838_v7  ;;  %2534 = vmatmul.mubr.bf16.gmra.mrb[4].mxu1 %v842_v8 }
 0x248   : > { %v2523_v9 = vpop.f32.mrb[0].mxu0  ;;  %v2531_v10 = vpop.f32.mrb[0].mxu1 }
 0x249   : > { %v941_v11 = vpop.f32.mrb[1].mxu0  ;;  %v973_v12 = vpop.f32.mrb[1].mxu1 }
 0x24a   : > { %v2524_v13 = vpop.f32.mrb[2].mxu0  ;;  %v2532_v14 = vpop.f32.mrb[2].mxu1 }
 0x24b   : > { %v1005_v15 = vpack.c.bf16 %v2524_v13, %v2523_v9  ;;  %v1009_v16 = vpack.c.bf16 %v2532_v14, %v2531_v10  ;;  %v944_v17 = vpop.f32.mrb[3].mxu0  ;;  %v976_v18 = vpop.f32.mrb[3].mxu1 }
 0x24c   : > { %v1004_v19 = vpack.c.bf16 %v944_v17, %v941_v11  ;;  %v1008_v20 = vpack.c.bf16 %v976_v18, %v973_v12 }
 0x24d   : > { %1015 = vst [vmem:[%s1013_s0 + $0x8] sm:$0xff] %v1005_v15  ;;  %1019 = vst [vmem:[%s1013_s0 + $0x28] sm:$0xff] %v1009_v16 }
 0x24e   : > { %1014 = vst [vmem:[%s1013_s0] sm:$0xff] %v1004_v19  ;;  %1018 = vst [vmem:[%s1013_s0 + $0x20] sm:$0xff] %v1008_v20 }
 0x250   : > { %v2527_v21 = vpop.f32.mrb[4].mxu0  ;;  %v2535_v22 = vpop.f32.mrb[4].mxu1 }
 0x251   : > { %v957_v23 = vpop.f32.mrb[5].mxu0  ;;  %v989_v24 = vpop.f32.mrb[5].mxu1 }
 0x252   : > { %v2528_v25 = vpop.f32.mrb[6].mxu0  ;;  %v2536_v26 = vpop.f32.mrb[6].mxu1 }
 0x253   : > { %v1007_v27 = vpack.c.bf16 %v2528_v25, %v2527_v21  ;;  %v1011_v28 = vpack.c.bf16 %v2536_v26, %v2535_v22  ;;  %v960_v29 = vpop.f32.mrb[7].mxu0  ;;  %v992_v30 = vpop.f32.mrb[7].mxu1 }
 0x254   : > { %v1006_v31 = vpack.c.bf16 %v960_v29, %v957_v23  ;;  %v1010_v32 = vpack.c.bf16 %v992_v30, %v989_v24 }
 0x255   : > { %1017 = vst [vmem:[%s1013_s0 + $0x18] sm:$0xff] %v1007_v27  ;;  %1021 = vst [vmem:[%s1013_s0 + $0x38] sm:$0xff] %v1011_v28 }
 0x256   : > { %1016 = vst [vmem:[%s1013_s0 + $0x10] sm:$0xff] %v1006_v31  ;;  %1020 = vst [vmem:[%s1013_s0 + $0x30] sm:$0xff] %v1010_v32 }
 0x257 PF: > { %p2353_p8 = scmp.ne.s32.totalorder %s2930_s19, 0 }
 0x258   : > { %v2957_v33 = vmov (!%p2353_p8), 0.0  }
 0x259   : > { %1024 = sbr.rel (%p2353_p8) target bundleno = 609 (0x261), region = 125  ;;  %1025 = vst [vmem:[#allocation5] sm:$0xff] (!%p2353_p8), %v2957_v33  ;;  %1026 = vst [vmem:[#allocation5 + $0x8] sm:$0xff] (!%p2353_p8), %v2957_v33 }
 0x25a   : > { %1027 = vst [vmem:[#allocation5 + $0x10] sm:$0xff] (!%p2353_p8), %v2957_v33  ;;  %1028 = vst [vmem:[#allocation5 + $0x18] sm:$0xff] (!%p2353_p8), %v2957_v33 }
 0x25b   : > { %1029 = vst [vmem:[#allocation5 + $0x20] sm:$0xff] (!%p2353_p8), %v2957_v33  ;;  %1030 = vst [vmem:[#allocation5 + $0x28] sm:$0xff] (!%p2353_p8), %v2957_v33 }
 0x25c   : > { %1031 = vst [vmem:[#allocation5 + $0x30] sm:$0xff] (!%p2353_p8), %v2957_v33  ;;  %1032 = vst [vmem:[#allocation5 + $0x38] sm:$0xff] (!%p2353_p8), %v2957_v33 }
 0x25d   : > { %1033 = vst [vmem:[#allocation5 + $0x40] sm:$0xff] (!%p2353_p8), %v2957_v33  ;;  %1034 = vst [vmem:[#allocation5 + $0x48] sm:$0xff] (!%p2353_p8), %v2957_v33 }
 0x25e   : > { %1035 = vst [vmem:[#allocation5 + $0x50] sm:$0xff] (!%p2353_p8), %v2957_v33  ;;  %1036 = vst [vmem:[#allocation5 + $0x58] sm:$0xff] (!%p2353_p8), %v2957_v33 }
 0x25f   : > { %1037 = vst [vmem:[#allocation5 + $0x60] sm:$0xff] (!%p2353_p8), %v2957_v33  ;;  %1038 = vst [vmem:[#allocation5 + $0x68] sm:$0xff] (!%p2353_p8), %v2957_v33 }
 0x260   : > { %1039 = vst [vmem:[#allocation5 + $0x70] sm:$0xff] %v2957_v33  ;;  %1040 = vst [vmem:[#allocation5 + $0x78] sm:$0xff] %v2957_v33 }
 0x261 PF: > { %s1073_s14 = sshra.s32 %s3127_s28, 4  ;;  %v3235_v34 = vld [vmem:[%s3149_s11] sm:$0xff]   ;;  %v3253_v44 = vld [vmem:[%s3149_s11 + $0x8] sm:$0xff]   ;;  %v3259_v46 = vld [vmem:[%s3149_s11 + $0x10] sm:$0xff]   ;;  %p2363_p9 = scmp.ne.s32.totalorder %s2938_s21, 0 }
 0x262   : > { %s2354_s12 = sshll.u32 %s1073_s14, 3  ;;  %v3238_v35 = vld [vmem:[%s3149_s11 + $0x20] sm:$0xff]   ;;  %2553 = vmatprep.mubr.bf16.mxu0 %v3235_v34  ;;  %v3256_v45 = vld [vmem:[%s3149_s11 + $0x28] sm:$0xff]   ;;  %v3262_v47 = vld [vmem:[%s3149_s11 + $0x30] sm:$0xff]   ;;  %vm2959_vm0 = vmmov (!%p2363_p9), 0   ;;  %s1265_s23 = scalar_lea.vmem (!%p2363_p9), [#allocation4], %s2930_s19 }
 0x263   : > { %s3241_s24 = scalar_lea.vmem [#allocation2], %s2354_s12  ;;  %2561 = vmatprep.mubr.bf16.mxu1 %v3238_v35  ;;  %v3269_v48 = vld [vmem:[%s3149_s11 + $0x18] sm:$0xff]   ;;  %v1059_v50 = vld [vmem:[#allocation5 + $0x10] sm:$0xff]  ;;  %v1057_v52 = vld [vmem:[#allocation5] sm:$0xff] }
 0x264   : > { %v1077_v36 = vld [vmem:[%s3241_s24] sm:$0xff]  ;;  %v1078_v37 = vld [vmem:[%s3241_s24 + $0x8] sm:$0xff]  ;;  %v1079_v38 = vld [vmem:[%s3241_s24 + $0x10] sm:$0xff] }
 0x265   : > { %2537 = vmatprep.subr.bf16.mxu0 %v1077_v36  ;;  %2701 = vmatprep.subr.bf16.mxu1 %v1077_v36  ;;  %v1080_v39 = vld [vmem:[%s3241_s24 + $0x18] sm:$0xff]  ;;  %v1081_v40 = vld [vmem:[%s3241_s24 + $0x20] sm:$0xff]  ;;  %v1082_v41 = vld [vmem:[%s3241_s24 + $0x28] sm:$0xff] }
 0x266   : > { %2538 = vmatpush3.bf16.msra.mxu0 %v1077_v36  ;;  %2709 = vmatpush3.bf16.msra.mxu1 %v1077_v36  ;;  %v1083_v42 = vld [vmem:[%s3241_s24 + $0x30] sm:$0xff]  ;;  %v1084_v43 = vld [vmem:[%s3241_s24 + $0x38] sm:$0xff]  ;;  %v1058_v62 = vld [vmem:[#allocation5 + $0x8] sm:$0xff]  ;;  %v2958_v36 = vmov (!%p2363_p9), 0.0  }
 0x267   : > { %2539 = vmatprep.subr.bf16.mxu0 %v1078_v37  ;;  %2702 = vmatprep.subr.bf16.mxu1 %v1078_v37  ;;  %v3272_v49 = vld [vmem:[%s3149_s11 + $0x38] sm:$0xff]   ;;  %v1067_v51 = vld [vmem:[#allocation5 + $0x50] sm:$0xff]  ;;  %v1065_v53 = vld [vmem:[#allocation5 + $0x40] sm:$0xff] }
 0x268   : > { %v1060_v56 = vld [vmem:[#allocation5 + $0x18] sm:$0xff]  ;;  %v1066_v63 = vld [vmem:[#allocation5 + $0x48] sm:$0xff]  ;;  %v1063_v10 = vld [vmem:[#allocation5 + $0x30] sm:$0xff] }
 0x269   : > { %v1068_v57 = vld [vmem:[#allocation5 + $0x58] sm:$0xff]  ;;  %v1071_v11 = vld [vmem:[#allocation5 + $0x70] sm:$0xff]  ;;  %v1061_v12 = vld [vmem:[#allocation5 + $0x20] sm:$0xff] }
 0x26a   : > { %2540 = vmatpush3.bf16.msra.mxu0 %v1078_v37  ;;  %2710 = vmatpush3.bf16.msra.mxu1 %v1078_v37  ;;  %v1069_v13 = vld [vmem:[#allocation5 + $0x60] sm:$0xff]  ;;  %v1064_v16 = vld [vmem:[#allocation5 + $0x38] sm:$0xff]  ;;  %v1062_v22 = vld [vmem:[#allocation5 + $0x28] sm:$0xff] }
 0x26b   : > { %2541 = vmatprep.subr.bf16.mxu0 %v1079_v38  ;;  %2703 = vmatprep.subr.bf16.mxu1 %v1079_v38  ;;  %v1072_v17 = vld [vmem:[#allocation5 + $0x78] sm:$0xff]  ;;  %v1070_v23 = vld [vmem:[#allocation5 + $0x68] sm:$0xff]  ;;  %v1266_v37 = vld [vmem:[%s1265_s23] sm:$0x1] (!%p2363_p9) }
 0x26e   : > { %2542 = vmatpush3.bf16.msra.mxu0 %v1079_v38  ;;  %2711 = vmatpush3.bf16.msra.mxu1 %v1079_v38 }
 0x26f   : > { %2543 = vmatprep.subr.bf16.mxu0 %v1080_v39  ;;  %2704 = vmatprep.subr.bf16.mxu1 %v1080_v39 }
 0x272   : > { %2544 = vmatpush3.bf16.msra.mxu0 %v1080_v39  ;;  %2712 = vmatpush3.bf16.msra.mxu1 %v1080_v39 }
 0x273   : > { %2545 = vmatprep.subr.bf16.mxu0 %v1081_v40  ;;  %2705 = vmatprep.subr.bf16.mxu1 %v1081_v40 }
 0x276   : > { %2546 = vmatpush3.bf16.msra.mxu0 %v1081_v40  ;;  %2713 = vmatpush3.bf16.msra.mxu1 %v1081_v40 }
 0x277   : > { %2547 = vmatprep.subr.bf16.mxu0 %v1082_v41  ;;  %2706 = vmatprep.subr.bf16.mxu1 %v1082_v41 }
 0x27a   : > { %2548 = vmatpush3.bf16.msra.mxu0 %v1082_v41  ;;  %2714 = vmatpush3.bf16.msra.mxu1 %v1082_v41 }
 0x27b   : > { %2549 = vmatprep.subr.bf16.mxu0 %v1083_v42  ;;  %2707 = vmatprep.subr.bf16.mxu1 %v1083_v42 }
 0x27e   : > { %2550 = vmatpush3.bf16.msra.mxu0 %v1083_v42  ;;  %2715 = vmatpush3.bf16.msra.mxu1 %v1083_v42 }
 0x27f   : > { %2551 = vmatprep.subr.bf16.mxu0 %v1084_v43  ;;  %2708 = vmatprep.subr.bf16.mxu1 %v1084_v43 }
 0x282   : > { %2552 = vmatpush3.bf16.msra.mxu0 %v1084_v43  ;;  %2716 = vmatpush3.bf16.msra.mxu1 %v1084_v43 }
 0x283   : > { %2569 = vmatprep.subr.bf16.mxu0 (!%p2363_p9), %v2958_v36 }
 0x285   : > { %2554 = vmatmul.mubr.bf16.vlgmr.msra.gmra.mrb[0].mxu0 %v3253_v44  ;;  %2562 = vmatmul.mubr.bf16.vlgmr.msra.gmra.mrb[0].mxu1 %v3256_v45 }
 0x286   : > { %2557 = vmatprep.mubr.bf16.mxu0 %v3259_v46  ;;  %2565 = vmatprep.mubr.bf16.mxu1 %v3262_v47 }
 0x287   : > { %2570 = vmatpush3.bf16.msra.mxu0 (!%p2363_p9), %v3235_v34  ;;  %v1267_v34 = vld [vmem:[%s550_s17] sm:$0x1] (!%p2363_p9) }
 0x288   : > { %2571 = vmatprep.subr.bf16.mxu0 (!%p2363_p9), %v2958_v36 }
 0x28b   : > { %2572 = vmatpush3.bf16.msra.mxu0 (!%p2363_p9), %v3253_v44 }
 0x28c   : > { %2573 = vmatprep.subr.bf16.mxu0 (!%p2363_p9), %v2958_v36 }
 0x28d   : > { %2558 = vmatmul.mubr.bf16.gmra.mrb[4].mxu0 %v3269_v48  ;;  %2566 = vmatmul.mubr.bf16.gmra.mrb[4].mxu1 %v3272_v49 }
 0x28e   : > { %2585 = vmatprep.mubr.msk.bf16.mxu0 (!%p2363_p9), %vm2959_vm0, %v2958_v36 }
 0x28f   : > { %2574 = vmatpush3.bf16.msra.mxu0 (!%p2363_p9), %v3259_v46 }
 0x290   : > { %2575 = vmatprep.subr.bf16.mxu0 (!%p2363_p9), %v2958_v36 }
 0x293   : > { %2576 = vmatpush3.bf16.msra.mxu0 (!%p2363_p9), %v3269_v48 }
 0x294   : > { %2577 = vmatprep.subr.bf16.mxu0 (!%p2363_p9), %v2958_v36 }
 0x297   : > { %2578 = vmatpush3.bf16.msra.mxu0 (!%p2363_p9), %v3238_v35 }
 0x298   : > { %2579 = vmatprep.subr.bf16.mxu0 (!%p2363_p9), %v2958_v36 }
 0x29b   : > { %2580 = vmatpush3.bf16.msra.mxu0 (!%p2363_p9), %v3256_v45 }
 0x29c   : > { %2581 = vmatprep.subr.bf16.mxu0 (!%p2363_p9), %v2958_v36 }
 0x29f   : > { %2582 = vmatpush3.bf16.msra.mxu0 (!%p2363_p9), %v3262_v47 }
 0x2a0   : > { %2583 = vmatprep.subr.bf16.mxu0 (!%p2363_p9), %v2958_v36 }
 0x2a3   : > { %2584 = vmatpush3.bf16.msra.mxu0 (!%p2363_p9), %v3272_v49 }
 0x358   : > { %v2555_v54 = vpop.f32.mrb[0].mxu0  ;;  %v2563_v55 = vpop.f32.mrb[0].mxu1 }
 0x359   : > { %v1232_v58 = vadd.f32 %v2555_v54, %v1059_v50  ;;  %v1240_v59 = vadd.f32 %v2563_v55, %v1067_v51  ;;  %v1167_v60 = vpop.f32.mrb[1].mxu0  ;;  %v1199_v61 = vpop.f32.mrb[1].mxu1 }
 0x35a   : > { %v1230_v0 = vadd.f32 %v1167_v60, %v1057_v52  ;;  %v1238_v1 = vadd.f32 %v1199_v61, %v1065_v53  ;;  %v2556_v2 = vpop.f32.mrb[2].mxu0  ;;  %v2564_v3 = vpop.f32.mrb[2].mxu1 }
 0x35b   : > { %1248 = vst [vmem:[#allocation5 + $0x10] sm:$0xff] %v1232_v58  ;;  %1256 = vst [vmem:[#allocation5 + $0x50] sm:$0xff] %v1240_v59  ;;  %v1233_v4 = vadd.f32 %v2556_v2, %v1060_v56  ;;  %v1241_v5 = vadd.f32 %v2564_v3, %v1068_v57  ;;  %v1170_v6 = vpop.f32.mrb[3].mxu0  ;;  %v1202_v7 = vpop.f32.mrb[3].mxu1  ;;  %2586 = vmatmul.mubr.bf16.vlgmr.msra.gmra.mrb[0].mxu0 (!%p2363_p9), %v1267_v34 }
 0x35c   : > { %1246 = vst [vmem:[#allocation5] sm:$0xff] %v1230_v0  ;;  %1254 = vst [vmem:[#allocation5 + $0x40] sm:$0xff] %v1238_v1  ;;  %v1231_v8 = vadd.f32 %v1170_v6, %v1058_v62  ;;  %v1239_v9 = vadd.f32 %v1202_v7, %v1066_v63 }
 0x35d   : > { %1249 = vst [vmem:[#allocation5 + $0x18] sm:$0xff] %v1233_v4  ;;  %1257 = vst [vmem:[#allocation5 + $0x58] sm:$0xff] %v1241_v5 }
 0x35e   : > { %1247 = vst [vmem:[#allocation5 + $0x8] sm:$0xff] %v1231_v8  ;;  %1255 = vst [vmem:[#allocation5 + $0x48] sm:$0xff] %v1239_v9 }
 0x360   : > { %v2559_v14 = vpop.f32.mrb[4].mxu0  ;;  %v2567_v15 = vpop.f32.mrb[4].mxu1  ;;  %1264 = sbr.rel (%p2363_p9) target bundleno = 1074 (0x432), region = 129 }
 0x361   : > { %v1236_v18 = vadd.f32 %v2559_v14, %v1063_v10  ;;  %v1244_v19 = vadd.f32 %v2567_v15, %v1071_v11  ;;  %v1183_v20 = vpop.f32.mrb[5].mxu0  ;;  %v1215_v21 = vpop.f32.mrb[5].mxu1 }
 0x362   : > { %v1234_v24 = vadd.f32 %v1183_v20, %v1061_v12  ;;  %v1242_v25 = vadd.f32 %v1215_v21, %v1069_v13  ;;  %v2560_v26 = vpop.f32.mrb[6].mxu0  ;;  %v2568_v27 = vpop.f32.mrb[6].mxu1 }
 0x363   : > { %1252 = vst [vmem:[#allocation5 + $0x30] sm:$0xff] %v1236_v18  ;;  %1260 = vst [vmem:[#allocation5 + $0x70] sm:$0xff] %v1244_v19  ;;  %v1237_v28 = vadd.f32 %v2560_v26, %v1064_v16  ;;  %v1245_v29 = vadd.f32 %v2568_v27, %v1072_v17  ;;  %v1186_v30 = vpop.f32.mrb[7].mxu0  ;;  %v1218_v31 = vpop.f32.mrb[7].mxu1 }
 0x364   : > { %1250 = vst [vmem:[#allocation5 + $0x20] sm:$0xff] %v1234_v24  ;;  %1258 = vst [vmem:[#allocation5 + $0x60] sm:$0xff] %v1242_v25  ;;  %v1235_v32 = vadd.f32 %v1186_v30, %v1062_v22  ;;  %v1243_v33 = vadd.f32 %v1218_v31, %v1070_v23 }
 0x365   : > { %1253 = vst [vmem:[#allocation5 + $0x38] sm:$0xff] %v1237_v28  ;;  %1261 = vst [vmem:[#allocation5 + $0x78] sm:$0xff] %v1245_v29 }
 0x366   : > { %1251 = vst [vmem:[#allocation5 + $0x28] sm:$0xff] %v1235_v32  ;;  %1259 = vst [vmem:[#allocation5 + $0x68] sm:$0xff] %v1243_v33 }
 0x42e   : > { %v1302_v38 = vpop.f32.mrb[0].mxu0 }
 0x42f   : > { %v1308_v39 = vadd.f32 %v1302_v38, %v1266_v37  ;;  %v2587_v35 = vpop.f32.mrb[1].mxu0 }
 0x430   : > { %v1305_v40 = vpop.f32.mrb[2].mxu0 }
 0x431   : > { %1309 = vst [vmem:[%s1265_s23] sm:$0x1] %v1308_v39  ;;  %v2588_v41 = vpop.f32.mrb[3].mxu0 }
 0x432 PF: > { %p1310_p10 = scmp.eq.s32.totalorder %s2930_s19, 2 }
 0x434   : > { %p1311_p11 = pnand %p1310_p10, %p560_p13 }
 0x435   : > { %v1333_v42 = vld [vmem:[%s3132_s16 + $0x10] sm:$0xff] (!%p1311_p11)  ;;  %v1331_v43 = vld [vmem:[%s3132_s16] sm:$0xff] (!%p1311_p11)  ;;  %v2960_v44 = vmov (!%p1311_p11), 0   ;;  %v1334_v45 = vld [vmem:[%s3132_s16 + $0x18] sm:$0xff] (!%p1311_p11)  ;;  %s3608_s13 = sshll.u32 (!%p1311_p11), %s2934_s20, 7 }
 0x436   : > { %1314 = sbr.rel (%p1311_p11) target bundleno = 1272 (0x4f8), region = 133  ;;  %2843 = vset.pattern.permute.xlu1 (!%p1311_p11), %v2960_v44  ;;  %2842 = vset.pattern.permute.xlu0 (!%p1311_p11), %v2960_v44  ;;  %v1332_v46 = vld [vmem:[%s3132_s16 + $0x8] sm:$0xff] (!%p1311_p11)  ;;  %v1335_v48 = vld [vmem:[%s3132_s16 + $0x20] sm:$0xff] (!%p1311_p11)  ;;  %v1338_v49 = vld [vmem:[%s3132_s16 + $0x38] sm:$0xff] (!%p1311_p11)  ;;  %s1602_s30 = sshra.s32 (!%p1311_p11), %s3608_s13, 4 }
 0x437   : > { %1359 = vperm.xlu1 (!%p1311_p11), %2843, %v1333_v42   ;;  %1349 = vperm.xlu0 (!%p1311_p11), %2842, %v1331_v43   ;;  %v1336_v47 = vld [vmem:[%s3132_s16 + $0x28] sm:$0xff] (!%p1311_p11)  ;;  %v1337_v50 = vld [vmem:[%s3132_s16 + $0x30] sm:$0xff] (!%p1311_p11)  ;;  %v1339_v52 = vld [vmem:[%s3132_s16 + $0x40] sm:$0xff] (!%p1311_p11)  ;;  %s2365_s27 = sshll.u32 (!%p1311_p11), %s1602_s30, 3 }
 0x438   : > { %v1340_v51 = vld [vmem:[%s3132_s16 + $0x48] sm:$0xff] (!%p1311_p11)  ;;  %v1342_v53 = vld [vmem:[%s3132_s16 + $0x58] sm:$0xff] (!%p1311_p11)  ;;  %v1341_v54 = vld [vmem:[%s3132_s16 + $0x50] sm:$0xff] (!%p1311_p11)  ;;  %s3349_s10 = scalar_lea.vmem (!%p1311_p11), [#allocation3], %s2365_s27 }
 0x439   : > { %v1344_v55 = vld [vmem:[%s3132_s16 + $0x68] sm:$0xff] (!%p1311_p11)  ;;  %v1343_v56 = vld [vmem:[%s3132_s16 + $0x60] sm:$0xff] (!%p1311_p11)  ;;  %v1346_v57 = vld [vmem:[%s3132_s16 + $0x78] sm:$0xff] (!%p1311_p11) }
 0x43a   : > { %v1345_v58 = vld [vmem:[%s3132_s16 + $0x70] sm:$0xff] (!%p1311_p11)  ;;  %v1483_v59 = vld [vmem:[%s3141_s29 + $0x8] sm:$0xff] (!%p1311_p11)  ;;  %v1482_v60 = vld [vmem:[%s3141_s29] sm:$0xff] (!%p1311_p11) }
 0x43b   : > { %1364 = vperm.xlu1 (!%p1311_p11), %2843, %v1334_v45   ;;  %1354 = vperm.xlu0 (!%p1311_p11), %2842, %v1332_v46   ;;  %v1485_v61 = vld [vmem:[%s3141_s29 + $0x18] sm:$0xff] (!%p1311_p11)  ;;  %v1484_v62 = vld [vmem:[%s3141_s29 + $0x10] sm:$0xff] (!%p1311_p11)  ;;  %v1487_v63 = vld [vmem:[%s3141_s29 + $0x28] sm:$0xff] (!%p1311_p11) }
 0x43c   : > { %v1486_v0 = vld [vmem:[%s3141_s29 + $0x20] sm:$0xff] (!%p1311_p11)  ;;  %v1489_v1 = vld [vmem:[%s3141_s29 + $0x38] sm:$0xff] (!%p1311_p11)  ;;  %v1488_v2 = vld [vmem:[%s3141_s29 + $0x30] sm:$0xff] (!%p1311_p11) }
 0x43d   : > { %v1491_v3 = vld [vmem:[%s3141_s29 + $0x48] sm:$0xff]  ;;  %v1490_v4 = vld [vmem:[%s3141_s29 + $0x40] sm:$0xff]  ;;  %v1493_v5 = vld [vmem:[%s3141_s29 + $0x58] sm:$0xff] }
 0x43e   : > { %v1492_v6 = vld [vmem:[%s3141_s29 + $0x50] sm:$0xff]  ;;  %v1495_v7 = vld [vmem:[%s3141_s29 + $0x68] sm:$0xff]  ;;  %v1494_v8 = vld [vmem:[%s3141_s29 + $0x60] sm:$0xff] }
 0x43f   : > { %1374 = vperm.xlu1 %2843, %v1336_v47   ;;  %1369 = vperm.xlu0 %2842, %v1335_v48   ;;  %v1497_v9 = vld [vmem:[%s3141_s29 + $0x78] sm:$0xff]  ;;  %v1496_v10 = vld [vmem:[%s3141_s29 + $0x70] sm:$0xff]  ;;  %v1316_v22 = vld [vmem:[#allocation5 + $0x8] sm:$0xff] }
 0x440   : > { %v1315_v21 = vld [vmem:[#allocation5] sm:$0xff]  ;;  %v1317_v28 = vld [vmem:[#allocation5 + $0x10] sm:$0xff]  ;;  %v1318_v29 = vld [vmem:[#allocation5 + $0x18] sm:$0xff] }
 0x441   : > { %v3331_v27 = vld [vmem:[%s3588_s6] ss:$0 sm:$0xff]  ;;  %v1320_v37 = vld [vmem:[#allocation5 + $0x28] sm:$0xff]  ;;  %v1322_v44 = vld [vmem:[#allocation5 + $0x38] sm:$0xff] }
 0x442   : > { %v1319_v38 = vld [vmem:[#allocation5 + $0x20] sm:$0xff]  ;;  %v1321_v47 = vld [vmem:[#allocation5 + $0x30] sm:$0xff] }
 0x443   : > { %1384 = vperm.xlu1 %2843, %v1338_v49   ;;  %1379 = vperm.xlu0 %2842, %v1337_v50  }
 0x447   : > { %1394 = vperm.xlu1 %2843, %v1340_v51   ;;  %1389 = vperm.xlu0 %2842, %v1339_v52  }
 0x44b   : > { %1404 = vperm.xlu1 %2843, %v1342_v53   ;;  %1399 = vperm.xlu0 %2842, %v1341_v54  }
 0x44f   : > { %1414 = vperm.xlu1 %2843, %v1344_v55   ;;  %1409 = vperm.xlu0 %2842, %v1343_v56  }
 0x453   : > { %1424 = vperm.xlu1 %2843, %v1346_v57   ;;  %1419 = vperm.xlu0 %2842, %v1345_v58  }
 0x457   : > { %1505 = vperm.xlu1 %2843, %v1483_v59   ;;  %1500 = vperm.xlu0 %2842, %v1482_v60   ;;  %v1324_v59 = vld [vmem:[#allocation5 + $0x48] sm:$0xff]  ;;  %v1323_v60 = vld [vmem:[#allocation5 + $0x40] sm:$0xff] }
 0x45b   : > { %1515 = vperm.xlu1 %2843, %v1485_v61   ;;  %1510 = vperm.xlu0 %2842, %v1484_v62  }
 0x45f   : > { %1525 = vperm.xlu1 %2843, %v1487_v63   ;;  %1520 = vperm.xlu0 %2842, %v1486_v0  }
 0x463   : > { %1535 = vperm.xlu1 %2843, %v1489_v1   ;;  %1530 = vperm.xlu0 %2842, %v1488_v2  }
 0x467   : > { %1545 = vperm.xlu1 %2843, %v1491_v3   ;;  %1540 = vperm.xlu0 %2842, %v1490_v4  }
 0x46b   : > { %1555 = vperm.xlu1 %2843, %v1493_v5   ;;  %1550 = vperm.xlu0 %2842, %v1492_v6  }
 0x46f   : > { %1565 = vperm.xlu1 %2843, %v1495_v7   ;;  %1560 = vperm.xlu0 %2842, %v1494_v8   ;;  %v1326_v7 = vld [vmem:[#allocation5 + $0x58] sm:$0xff]  ;;  %v1325_v8 = vld [vmem:[#allocation5 + $0x50] sm:$0xff] }
 0x473   : > { %1575 = vperm.xlu1 %2843, %v1497_v9   ;;  %1570 = vperm.xlu0 %2842, %v1496_v10  }
 0x4b6   : > { %v1360_v11 = vpop.permute.xlu1 %1359  ;;  %v1350_v12 = vpop.permute.xlu0 %1349 }
 0x4b7   : > { %v1427_v25 = vmul.f32 %v1350_v12, %v1315_v21  ;;  %v1429_v32 = vmul.f32 %v1360_v11, %v1317_v28  ;;  %v1328_v21 = vld [vmem:[#allocation5 + $0x68] sm:$0xff] }
 0x4b9   : > { %v1450_v33 = vadd.f32 %v3331_v27, %v1427_v25  ;;  %v1452_v42 = vadd.f32 %v3331_v27, %v1429_v32 }
 0x4ba   : > { %v1365_v13 = vpop.permute.xlu1 %1364  ;;  %v1355_v14 = vpop.permute.xlu0 %1354 }
 0x4bb   : > { %v1428_v26 = vmul.f32 %v1355_v14, %v1316_v22  ;;  %v1430_v36 = vmul.f32 %v1365_v13, %v1318_v29  ;;  %v1466_v46 = vmax.f32 %v1450_v33, 0.0  ;;  %v1468_v58 = vmax.f32 %v1452_v42, 0.0 }
 0x4bd   : > { %v1451_v34 = vadd.f32 %v3331_v27, %v1428_v26  ;;  %v1453_v43 = vadd.f32 %v3331_v27, %v1430_v36 }
 0x4be   : > { %v1375_v15 = vpop.permute.xlu1 %1374  ;;  %v1370_v16 = vpop.permute.xlu0 %1369 }
 0x4bf   : > { %v1432_v40 = vmul.f32 %v1375_v15, %v1320_v37  ;;  %v1431_v41 = vmul.f32 %v1370_v16, %v1319_v38  ;;  %v1467_v45 = vmax.f32 %v1451_v34, 0.0  ;;  %v1469_v57 = vmax.f32 %v1453_v43, 0.0  ;;  %v1330_v38 = vld [vmem:[#allocation5 + $0x78] sm:$0xff] }
 0x4c1   : > { %v1455_v52 = vadd.f32 %v3331_v27, %v1432_v40  ;;  %v1454_v53 = vadd.f32 %v3331_v27, %v1431_v41  ;;  %v1329_v40 = vld [vmem:[#allocation5 + $0x70] sm:$0xff] }
 0x4c2   : > { %v1385_v17 = vpop.permute.xlu1 %1384  ;;  %v1380_v18 = vpop.permute.xlu0 %1379 }
 0x4c3   : > { %v1434_v54 = vmul.f32 %v1385_v17, %v1322_v44  ;;  %v1433_v55 = vmul.f32 %v1380_v18, %v1321_v47  ;;  %v1471_v2 = vmax.f32 %v1455_v52, 0.0  ;;  %v1470_v3 = vmax.f32 %v1454_v53, 0.0 }
 0x4c5   : > { %v1457_v1 = vadd.f32 %v3331_v27, %v1434_v54  ;;  %v1456_v4 = vadd.f32 %v3331_v27, %v1433_v55 }
 0x4c6   : > { %v1395_v19 = vpop.permute.xlu1 %1394  ;;  %v1390_v20 = vpop.permute.xlu0 %1389 }
 0x4c7   : > { %v1436_v5 = vmul.f32 %v1395_v19, %v1324_v59  ;;  %v1435_v6 = vmul.f32 %v1390_v20, %v1323_v60  ;;  %v1473_v16 = vmax.f32 %v1457_v1, 0.0  ;;  %v1472_v19 = vmax.f32 %v1456_v4, 0.0  ;;  %v1327_v20 = vld [vmem:[#allocation5 + $0x60] sm:$0xff] }
 0x4c9   : > { %v1459_v17 = vadd.f32 %v3331_v27, %v1436_v5  ;;  %v1458_v18 = vadd.f32 %v3331_v27, %v1435_v6 }
 0x4ca   : > { %v1405_v23 = vpop.permute.xlu1 %1404  ;;  %v1400_v24 = vpop.permute.xlu0 %1399 }
 0x4cb   : > { %v1438_v14 = vmul.f32 %v1405_v23, %v1326_v7  ;;  %v1437_v15 = vmul.f32 %v1400_v24, %v1325_v8  ;;  %v1475_v34 = vmax.f32 %v1459_v17, 0.0  ;;  %v1474_v37 = vmax.f32 %v1458_v18, 0.0 }
 0x4cd   : > { %v1461_v32 = vadd.f32 %v3331_v27, %v1438_v14  ;;  %v1460_v23 = vadd.f32 %v3331_v27, %v1437_v15 }
 0x4ce   : > { %v3333_v30 = vpop.permute.xlu1 %1414  ;;  %v3335_v31 = vpop.permute.xlu0 %1409 }
 0x4cf   : > { %v1440_v24 = vmul.f32 %v3333_v30, %v1328_v21  ;;  %v1439_v33 = vmul.f32 %v3335_v31, %v1327_v20  ;;  %v1476_v47 = vmax.f32 %v1460_v23, 0.0 }
 0x4d2   : > { %v3339_v39 = vpop.permute.xlu1 %1424  ;;  %v3341_v35 = vpop.permute.xlu0 %1419 }
 0x4d3   : > { %v1442_v30 = vmul.f32 %v3339_v39, %v1330_v38  ;;  %v1441_v31 = vmul.f32 %v3341_v35, %v1329_v40 }
 0x4d5   : > { %v1465_v55 = vadd.f32 %v3331_v27, %v1442_v30 }
 0x4d6   : > { %v1506_v48 = vpop.permute.xlu1 %1505  ;;  %v1501_v49 = vpop.permute.xlu0 %1500 }
 0x4d7   : > { %v1579_v50 = vmul.f32 %v1506_v48, %v1467_v45  ;;  %v1578_v51 = vmul.f32 %v1501_v49, %v1466_v46  ;;  %v1463_v45 = vadd.f32 %v3331_v27, %v1440_v24  ;;  %v1477_v46 = vmax.f32 %v1461_v32, 0.0 }
 0x4d8   : > { %v1462_v48 = vadd.f32 %v3331_v27, %v1439_v33 }
 0x4d9   : > { %v1594_v56 = vpack.c.bf16 %v1579_v50, %v1578_v51  ;;  %v1479_v54 = vmax.f32 %v1463_v45, 0.0 }
 0x4da   : > { %v1516_v61 = vpop.permute.xlu1 %1515  ;;  %v1511_v62 = vpop.permute.xlu0 %1510 }
 0x4db   : > { %1606 = vst [vmem:[%s3349_s10] sm:$0xff] %v1594_v56  ;;  %v1581_v63 = vmul.f32 %v1516_v61, %v1469_v57  ;;  %v1580_v0 = vmul.f32 %v1511_v62, %v1468_v58  ;;  %v1464_v56 = vadd.f32 %v3331_v27, %v1441_v31  ;;  %v1478_v58 = vmax.f32 %v1462_v48, 0.0 }
 0x4dc   : > { %v1481_v62 = vmax.f32 %v1465_v55, 0.0 }
 0x4dd   : > { %v1595_v9 = vpack.c.bf16 %v1581_v63, %v1580_v0  ;;  %v1480_v63 = vmax.f32 %v1464_v56, 0.0 }
 0x4de   : > { %v1526_v10 = vpop.permute.xlu1 %1525  ;;  %v1521_v11 = vpop.permute.xlu0 %1520 }
 0x4df   : > { %1607 = vst [vmem:[%s3349_s10 + $0x8] sm:$0xff] %v1595_v9  ;;  %v1583_v12 = vmul.f32 %v1526_v10, %v1471_v2  ;;  %v1582_v13 = vmul.f32 %v1521_v11, %v1470_v3 }
 0x4e1   : > { %v1596_v22 = vpack.c.bf16 %v1583_v12, %v1582_v13 }
 0x4e2   : > { %v1536_v25 = vpop.permute.xlu1 %1535  ;;  %v1531_v26 = vpop.permute.xlu0 %1530 }
 0x4e3   : > { %1608 = vst [vmem:[%s3349_s10 + $0x10] sm:$0xff] %v1596_v22  ;;  %v1585_v28 = vmul.f32 %v1536_v25, %v1473_v16  ;;  %v1584_v29 = vmul.f32 %v1531_v26, %v1472_v19 }
 0x4e5   : > { %v1597_v36 = vpack.c.bf16 %v1585_v28, %v1584_v29 }
 0x4e6   : > { %v1546_v41 = vpop.permute.xlu1 %1545  ;;  %v1541_v42 = vpop.permute.xlu0 %1540 }
 0x4e7   : > { %1609 = vst [vmem:[%s3349_s10 + $0x18] sm:$0xff] %v1597_v36  ;;  %v1587_v43 = vmul.f32 %v1546_v41, %v1475_v34  ;;  %v1586_v44 = vmul.f32 %v1541_v42, %v1474_v37 }
 0x4e9   : > { %v1598_v49 = vpack.c.bf16 %v1587_v43, %v1586_v44 }
 0x4ea   : > { %v1556_v50 = vpop.permute.xlu1 %1555  ;;  %v1551_v51 = vpop.permute.xlu0 %1550 }
 0x4eb   : > { %1610 = vst [vmem:[%s3349_s10 + $0x20] sm:$0xff] %v1598_v49  ;;  %v1589_v52 = vmul.f32 %v1556_v50, %v1477_v46  ;;  %v1588_v53 = vmul.f32 %v1551_v51, %v1476_v47 }
 0x4ed   : > { %v1599_v57 = vpack.c.bf16 %v1589_v52, %v1588_v53 }
 0x4ee   : > { %v1566_v59 = vpop.permute.xlu1 %1565  ;;  %v1561_v60 = vpop.permute.xlu0 %1560 }
 0x4ef   : > { %1611 = vst [vmem:[%s3349_s10 + $0x28] sm:$0xff] %v1599_v57  ;;  %v1591_v39 = vmul.f32 %v1566_v59, %v1479_v54  ;;  %v1590_v35 = vmul.f32 %v1561_v60, %v1478_v58 }
 0x4f1   : > { %v1600_v61 = vpack.c.bf16 %v1591_v39, %v1590_v35 }
 0x4f2   : > { %v1576_v0 = vpop.permute.xlu1 %1575  ;;  %v1571_v1 = vpop.permute.xlu0 %1570 }
 0x4f3   : > { %1612 = vst [vmem:[%s3349_s10 + $0x30] sm:$0xff] %v1600_v61  ;;  %v1593_v2 = vmul.f32 %v1576_v0, %v1481_v62  ;;  %v1592_v3 = vmul.f32 %v1571_v1, %v1480_v63 }
 0x4f5   : > { %v1601_v4 = vpack.c.bf16 %v1593_v2, %v1592_v3 }
 0x4f7   : > { %1613 = vst [vmem:[%s3349_s10 + $0x38] sm:$0xff] %v1601_v4 }
 0x4f8 PF: > { %p1614_p12 = scmp.eq.s32.totalorder %s2938_s21, 1 }
 0x4fa   : > { %p1615_p13 = pnand %p1614_p12, %p1310_p10 }
 0x4fb   : > { %v1637_v27 = vld [vmem:[%s3132_s16 + $0x10] sm:$0xff] (!%p1615_p13)  ;;  %v1635_v5 = vld [vmem:[%s3132_s16] sm:$0xff] (!%p1615_p13)  ;;  %v2961_v6 = vmov (!%p1615_p13), 0   ;;  %v1638_v7 = vld [vmem:[%s3132_s16 + $0x18] sm:$0xff] (!%p1615_p13)  ;;  %s3609_s0 = sshll.u32 (!%p1615_p13), %s2934_s20, 7 }
 0x4fc   : > { %1618 = sbr.rel (%p1615_p13) target bundleno = 1470 (0x5be), region = 137  ;;  %2845 = vset.pattern.permute.xlu1 (!%p1615_p13), %v2961_v6  ;;  %2844 = vset.pattern.permute.xlu0 (!%p1615_p13), %v2961_v6  ;;  %v1636_v8 = vld [vmem:[%s3132_s16 + $0x8] sm:$0xff] (!%p1615_p13)  ;;  %v1639_v10 = vld [vmem:[%s3132_s16 + $0x20] sm:$0xff] (!%p1615_p13)  ;;  %v1642_v11 = vld [vmem:[%s3132_s16 + $0x38] sm:$0xff] (!%p1615_p13)  ;;  %s1906_s14 = sshra.s32 (!%p1615_p13), %s3609_s0, 4 }
 0x4fd   : > { %1663 = vperm.xlu1 (!%p1615_p13), %2845, %v1637_v27   ;;  %1653 = vperm.xlu0 (!%p1615_p13), %2844, %v1635_v5   ;;  %v1640_v9 = vld [vmem:[%s3132_s16 + $0x28] sm:$0xff] (!%p1615_p13)  ;;  %v1641_v12 = vld [vmem:[%s3132_s16 + $0x30] sm:$0xff] (!%p1615_p13)  ;;  %v1643_v14 = vld [vmem:[%s3132_s16 + $0x40] sm:$0xff] (!%p1615_p13)  ;;  %s2367_s12 = sshll.u32 (!%p1615_p13), %s1906_s14, 3 }
 0x4fe   : > { %v1644_v13 = vld [vmem:[%s3132_s16 + $0x48] sm:$0xff] (!%p1615_p13)  ;;  %v1646_v15 = vld [vmem:[%s3132_s16 + $0x58] sm:$0xff] (!%p1615_p13)  ;;  %v1645_v16 = vld [vmem:[%s3132_s16 + $0x50] sm:$0xff] (!%p1615_p13)  ;;  %s3431_s24 = scalar_lea.vmem (!%p1615_p13), [#allocation3], %s2367_s12 }
 0x4ff   : > { %v1648_v17 = vld [vmem:[%s3132_s16 + $0x68] sm:$0xff] (!%p1615_p13)  ;;  %v1647_v18 = vld [vmem:[%s3132_s16 + $0x60] sm:$0xff] (!%p1615_p13)  ;;  %v1650_v21 = vld [vmem:[%s3132_s16 + $0x78] sm:$0xff] (!%p1615_p13) }
 0x500   : > { %v1649_v22 = vld [vmem:[%s3132_s16 + $0x70] sm:$0xff] (!%p1615_p13)  ;;  %v1787_v19 = vld [vmem:[%s3141_s29 + $0x8] sm:$0xff] (!%p1615_p13)  ;;  %v1786_v20 = vld [vmem:[%s3141_s29] sm:$0xff] (!%p1615_p13) }
 0x501   : > { %1668 = vperm.xlu1 (!%p1615_p13), %2845, %v1638_v7   ;;  %1658 = vperm.xlu0 (!%p1615_p13), %2844, %v1636_v8   ;;  %v1789_v25 = vld [vmem:[%s3141_s29 + $0x18] sm:$0xff] (!%p1615_p13)  ;;  %v1788_v26 = vld [vmem:[%s3141_s29 + $0x10] sm:$0xff] (!%p1615_p13)  ;;  %v1791_v28 = vld [vmem:[%s3141_s29 + $0x28] sm:$0xff] (!%p1615_p13) }
 0x502   : > { %v1790_v29 = vld [vmem:[%s3141_s29 + $0x20] sm:$0xff] (!%p1615_p13)  ;;  %v1793_v32 = vld [vmem:[%s3141_s29 + $0x38] sm:$0xff] (!%p1615_p13)  ;;  %v1792_v23 = vld [vmem:[%s3141_s29 + $0x30] sm:$0xff] (!%p1615_p13) }
 0x503   : > { %v1795_v24 = vld [vmem:[%s3141_s29 + $0x48] sm:$0xff]  ;;  %v1794_v33 = vld [vmem:[%s3141_s29 + $0x40] sm:$0xff]  ;;  %v1797_v36 = vld [vmem:[%s3141_s29 + $0x58] sm:$0xff] }
 0x504   : > { %v1796_v34 = vld [vmem:[%s3141_s29 + $0x50] sm:$0xff]  ;;  %v1799_v37 = vld [vmem:[%s3141_s29 + $0x68] sm:$0xff]  ;;  %v1798_v38 = vld [vmem:[%s3141_s29 + $0x60] sm:$0xff] }
 0x505   : > { %1678 = vperm.xlu1 %2845, %v1640_v9   ;;  %1673 = vperm.xlu0 %2844, %v1639_v10   ;;  %v1801_v40 = vld [vmem:[%s3141_s29 + $0x78] sm:$0xff]  ;;  %v1800_v41 = vld [vmem:[%s3141_s29 + $0x70] sm:$0xff]  ;;  %v1620_v51 = vld [vmem:[#allocation5 + $0x8] sm:$0xff] }
 0x506   : > { %v1619_v50 = vld [vmem:[#allocation5] sm:$0xff]  ;;  %v1621_v57 = vld [vmem:[#allocation5 + $0x10] sm:$0xff]  ;;  %v1622_v58 = vld [vmem:[#allocation5 + $0x18] sm:$0xff] }
 0x507   : > { %v3413_v56 = vld [vmem:[%s3590_s8] ss:$0 sm:$0xff]  ;;  %v1624_v63 = vld [vmem:[#allocation5 + $0x28] sm:$0xff]  ;;  %v1626_v6 = vld [vmem:[#allocation5 + $0x38] sm:$0xff] }
 0x508   : > { %v1623_v0 = vld [vmem:[#allocation5 + $0x20] sm:$0xff]  ;;  %v1625_v9 = vld [vmem:[#allocation5 + $0x30] sm:$0xff] }
 0x509   : > { %1688 = vperm.xlu1 %2845, %v1642_v11   ;;  %1683 = vperm.xlu0 %2844, %v1641_v12  }
 0x50d   : > { %1698 = vperm.xlu1 %2845, %v1644_v13   ;;  %1693 = vperm.xlu0 %2844, %v1643_v14  }
 0x511   : > { %1708 = vperm.xlu1 %2845, %v1646_v15   ;;  %1703 = vperm.xlu0 %2844, %v1645_v16  }
 0x515   : > { %1718 = vperm.xlu1 %2845, %v1648_v17   ;;  %1713 = vperm.xlu0 %2844, %v1647_v18  }
 0x519   : > { %1728 = vperm.xlu1 %2845, %v1650_v21   ;;  %1723 = vperm.xlu0 %2844, %v1649_v22  }
 0x51d   : > { %1809 = vperm.xlu1 %2845, %v1787_v19   ;;  %1804 = vperm.xlu0 %2844, %v1786_v20   ;;  %v1628_v19 = vld [vmem:[#allocation5 + $0x48] sm:$0xff]  ;;  %v1627_v20 = vld [vmem:[#allocation5 + $0x40] sm:$0xff] }
 0x521   : > { %1819 = vperm.xlu1 %2845, %v1789_v25   ;;  %1814 = vperm.xlu0 %2844, %v1788_v26  }
 0x525   : > { %1829 = vperm.xlu1 %2845, %v1791_v28   ;;  %1824 = vperm.xlu0 %2844, %v1790_v29  }
 0x529   : > { %1839 = vperm.xlu1 %2845, %v1793_v32   ;;  %1834 = vperm.xlu0 %2844, %v1792_v23  }
 0x52d   : > { %1849 = vperm.xlu1 %2845, %v1795_v24   ;;  %1844 = vperm.xlu0 %2844, %v1794_v33  }
 0x531   : > { %1859 = vperm.xlu1 %2845, %v1797_v36   ;;  %1854 = vperm.xlu0 %2844, %v1796_v34  }
 0x535   : > { %1869 = vperm.xlu1 %2845, %v1799_v37   ;;  %1864 = vperm.xlu0 %2844, %v1798_v38   ;;  %v1630_v37 = vld [vmem:[#allocation5 + $0x58] sm:$0xff]  ;;  %v1629_v38 = vld [vmem:[#allocation5 + $0x50] sm:$0xff] }
 0x539   : > { %1879 = vperm.xlu1 %2845, %v1801_v40   ;;  %1874 = vperm.xlu0 %2844, %v1800_v41  }
 0x57c   : > { %v1664_v42 = vpop.permute.xlu1 %1663  ;;  %v1654_v43 = vpop.permute.xlu0 %1653 }
 0x57d   : > { %v1731_v54 = vmul.f32 %v1654_v43, %v1619_v50  ;;  %v1733_v39 = vmul.f32 %v1664_v42, %v1621_v57  ;;  %v1632_v50 = vld [vmem:[#allocation5 + $0x68] sm:$0xff] }
 0x57f   : > { %v1754_v35 = vadd.f32 %v3413_v56, %v1731_v54  ;;  %v1756_v27 = vadd.f32 %v3413_v56, %v1733_v39 }
 0x580   : > { %v1669_v44 = vpop.permute.xlu1 %1668  ;;  %v1659_v45 = vpop.permute.xlu0 %1658 }
 0x581   : > { %v1732_v55 = vmul.f32 %v1659_v45, %v1620_v51  ;;  %v1734_v61 = vmul.f32 %v1669_v44, %v1622_v58  ;;  %v1770_v8 = vmax.f32 %v1754_v35, 0.0  ;;  %v1772_v22 = vmax.f32 %v1756_v27, 0.0 }
 0x583   : > { %v1755_v62 = vadd.f32 %v3413_v56, %v1732_v55  ;;  %v1757_v5 = vadd.f32 %v3413_v56, %v1734_v61 }
 0x584   : > { %v1679_v46 = vpop.permute.xlu1 %1678  ;;  %v1674_v47 = vpop.permute.xlu0 %1673 }
 0x585   : > { %v1736_v3 = vmul.f32 %v1679_v46, %v1624_v63  ;;  %v1735_v4 = vmul.f32 %v1674_v47, %v1623_v0  ;;  %v1771_v7 = vmax.f32 %v1755_v62, 0.0  ;;  %v1773_v21 = vmax.f32 %v1757_v5, 0.0  ;;  %v1634_v0 = vld [vmem:[#allocation5 + $0x78] sm:$0xff] }
 0x587   : > { %v1759_v14 = vadd.f32 %v3413_v56, %v1736_v3  ;;  %v1758_v15 = vadd.f32 %v3413_v56, %v1735_v4  ;;  %v1633_v3 = vld [vmem:[#allocation5 + $0x70] sm:$0xff] }
 0x588   : > { %v1689_v48 = vpop.permute.xlu1 %1688  ;;  %v1684_v30 = vpop.permute.xlu0 %1683 }
 0x589   : > { %v1738_v16 = vmul.f32 %v1689_v48, %v1626_v6  ;;  %v1737_v17 = vmul.f32 %v1684_v30, %v1625_v9  ;;  %v1775_v23 = vmax.f32 %v1759_v14, 0.0  ;;  %v1774_v24 = vmax.f32 %v1758_v15, 0.0 }
 0x58b   : > { %v1761_v32 = vadd.f32 %v3413_v56, %v1738_v16  ;;  %v1760_v33 = vadd.f32 %v3413_v56, %v1737_v17 }
 0x58c   : > { %v1699_v31 = vpop.permute.xlu1 %1698  ;;  %v1694_v49 = vpop.permute.xlu0 %1693 }
 0x58d   : > { %v1740_v36 = vmul.f32 %v1699_v31, %v1628_v19  ;;  %v1739_v34 = vmul.f32 %v1694_v49, %v1627_v20  ;;  %v1777_v47 = vmax.f32 %v1761_v32, 0.0  ;;  %v1776_v31 = vmax.f32 %v1760_v33, 0.0  ;;  %v1631_v49 = vld [vmem:[#allocation5 + $0x60] sm:$0xff] }
 0x58f   : > { %v1763_v48 = vadd.f32 %v3413_v56, %v1740_v36  ;;  %v1762_v30 = vadd.f32 %v3413_v56, %v1739_v34 }
 0x590   : > { %v1709_v52 = vpop.permute.xlu1 %1708  ;;  %v1704_v53 = vpop.permute.xlu0 %1703 }
 0x591   : > { %v1742_v45 = vmul.f32 %v1709_v52, %v1630_v37  ;;  %v1741_v46 = vmul.f32 %v1704_v53, %v1629_v38  ;;  %v1779_v62 = vmax.f32 %v1763_v48, 0.0  ;;  %v1778_v63 = vmax.f32 %v1762_v30, 0.0 }
 0x593   : > { %v1765_v39 = vadd.f32 %v3413_v56, %v1742_v45  ;;  %v1764_v52 = vadd.f32 %v3413_v56, %v1741_v46 }
 0x594   : > { %v3415_v59 = vpop.permute.xlu1 %1718  ;;  %v3417_v60 = vpop.permute.xlu0 %1713 }
 0x595   : > { %v1744_v53 = vmul.f32 %v3415_v59, %v1632_v50  ;;  %v1743_v35 = vmul.f32 %v3417_v60, %v1631_v49  ;;  %v1780_v9 = vmax.f32 %v1764_v52, 0.0 }
 0x598   : > { %v3421_v1 = vpop.permute.xlu1 %1728  ;;  %v3423_v2 = vpop.permute.xlu0 %1723 }
 0x599   : > { %v1746_v59 = vmul.f32 %v3421_v1, %v1634_v0  ;;  %v1745_v60 = vmul.f32 %v3423_v2, %v1633_v3 }
 0x59b   : > { %v1769_v17 = vadd.f32 %v3413_v56, %v1746_v59 }
 0x59c   : > { %v1810_v10 = vpop.permute.xlu1 %1809  ;;  %v1805_v11 = vpop.permute.xlu0 %1804 }
 0x59d   : > { %v1883_v12 = vmul.f32 %v1810_v10, %v1771_v7  ;;  %v1882_v13 = vmul.f32 %v1805_v11, %v1770_v8  ;;  %v1767_v7 = vadd.f32 %v3413_v56, %v1744_v53  ;;  %v1781_v8 = vmax.f32 %v1765_v39, 0.0 }
 0x59e   : > { %v1766_v10 = vadd.f32 %v3413_v56, %v1743_v35 }
 0x59f   : > { %v1898_v18 = vpack.c.bf16 %v1883_v12, %v1882_v13  ;;  %v1783_v16 = vmax.f32 %v1767_v7, 0.0 }
 0x5a0   : > { %v1820_v25 = vpop.permute.xlu1 %1819  ;;  %v1815_v26 = vpop.permute.xlu0 %1814 }
 0x5a1   : > { %1910 = vst [vmem:[%s3431_s24] sm:$0xff] %v1898_v18  ;;  %v1885_v28 = vmul.f32 %v1820_v25, %v1773_v21  ;;  %v1884_v29 = vmul.f32 %v1815_v26, %v1772_v22  ;;  %v1768_v18 = vadd.f32 %v3413_v56, %v1745_v60  ;;  %v1782_v22 = vmax.f32 %v1766_v10, 0.0 }
 0x5a2   : > { %v1785_v26 = vmax.f32 %v1769_v17, 0.0 }
 0x5a3   : > { %v1899_v40 = vpack.c.bf16 %v1885_v28, %v1884_v29  ;;  %v1784_v28 = vmax.f32 %v1768_v18, 0.0 }
 0x5a4   : > { %v1830_v41 = vpop.permute.xlu1 %1829  ;;  %v1825_v42 = vpop.permute.xlu0 %1824 }
 0x5a5   : > { %1911 = vst [vmem:[%s3431_s24 + $0x8] sm:$0xff] %v1899_v40  ;;  %v1887_v43 = vmul.f32 %v1830_v41, %v1775_v23  ;;  %v1886_v44 = vmul.f32 %v1825_v42, %v1774_v24 }
 0x5a7   : > { %v1900_v51 = vpack.c.bf16 %v1887_v43, %v1886_v44 }
 0x5a8   : > { %v1840_v54 = vpop.permute.xlu1 %1839  ;;  %v1835_v55 = vpop.permute.xlu0 %1834 }
 0x5a9   : > { %1912 = vst [vmem:[%s3431_s24 + $0x10] sm:$0xff] %v1900_v51  ;;  %v1889_v57 = vmul.f32 %v1840_v54, %v1777_v47  ;;  %v1888_v58 = vmul.f32 %v1835_v55, %v1776_v31 }
 0x5ab   : > { %v1901_v61 = vpack.c.bf16 %v1889_v57, %v1888_v58 }
 0x5ac   : > { %v1850_v4 = vpop.permute.xlu1 %1849  ;;  %v1845_v27 = vpop.permute.xlu0 %1844 }
 0x5ad   : > { %1913 = vst [vmem:[%s3431_s24 + $0x18] sm:$0xff] %v1901_v61  ;;  %v1891_v5 = vmul.f32 %v1850_v4, %v1779_v62  ;;  %v1890_v6 = vmul.f32 %v1845_v27, %v1778_v63 }
 0x5af   : > { %v1902_v11 = vpack.c.bf16 %v1891_v5, %v1890_v6 }
 0x5b0   : > { %v1860_v12 = vpop.permute.xlu1 %1859  ;;  %v1855_v13 = vpop.permute.xlu0 %1854 }
 0x5b1   : > { %1914 = vst [vmem:[%s3431_s24 + $0x20] sm:$0xff] %v1902_v11  ;;  %v1893_v14 = vmul.f32 %v1860_v12, %v1781_v8  ;;  %v1892_v15 = vmul.f32 %v1855_v13, %v1780_v9 }
 0x5b3   : > { %v1903_v21 = vpack.c.bf16 %v1893_v14, %v1892_v15 }
 0x5b4   : > { %v1870_v19 = vpop.permute.xlu1 %1869  ;;  %v1865_v20 = vpop.permute.xlu0 %1864 }
 0x5b5   : > { %1915 = vst [vmem:[%s3431_s24 + $0x28] sm:$0xff] %v1903_v21  ;;  %v1895_v1 = vmul.f32 %v1870_v19, %v1783_v16  ;;  %v1894_v2 = vmul.f32 %v1865_v20, %v1782_v22 }
 0x5b7   : > { %v1904_v25 = vpack.c.bf16 %v1895_v1, %v1894_v2 }
 0x5b8   : > { %v1880_v29 = vpop.permute.xlu1 %1879  ;;  %v1875_v32 = vpop.permute.xlu0 %1874 }
 0x5b9   : > { %1916 = vst [vmem:[%s3431_s24 + $0x30] sm:$0xff] %v1904_v25  ;;  %v1897_v23 = vmul.f32 %v1880_v29, %v1785_v26  ;;  %v1896_v24 = vmul.f32 %v1875_v32, %v1784_v28 }
 0x5bb   : > { %v1905_v33 = vpack.c.bf16 %v1897_v23, %v1896_v24 }
 0x5bd   : > { %1917 = vst [vmem:[%s3431_s24 + $0x38] sm:$0xff] %v1905_v33 }
 0x5be PF: > { %p1918_p0 = scmp.eq.s32.totalorder %s2934_s20, 2 }
 0x5c0   : > { %p1919_p1 = pnand %p1918_p0, %p1614_p12 }
 0x5c2   : > { %p1920_p2 = pneg %p1919_p1 }
 0x5c4   : > { %p1921_p3 = pnand %p1920_p2, %p1310_p10 }
 0x5c5   : > { %v1927_v56 = vld [vmem:[#allocation3] sm:$0xff] (!%p1921_p3)  ;;  %v2962_v36 = vmov (!%p1921_p3), 0.0   ;;  %vm2963_vm1 = vmmov (!%p1921_p3), 0   ;;  %v1928_v37 = vld [vmem:[#allocation3 + $0x8] sm:$0xff] (!%p1921_p3)  ;;  %v1929_v40 = vld [vmem:[#allocation3 + $0x10] sm:$0xff] (!%p1921_p3)  ;;  %s3610_s19 = sld [smem:[#allocation16_spill]] (!%p1921_p3) }
 0x5c6   : > { %1924 = sbr.rel (%p1921_p3) target bundleno = 1975 (0x7b7), region = 141  ;;  %2609 = vmatprep.subr.bf16.mxu0 (!%p1921_p3), %v2962_v36  ;;  %2589 = vmatprep.subr.bf16.mxu1 (!%p1921_p3), %v2962_v36  ;;  %v1938_v34 = vld [vmem:[#allocation3 + $0x40] sm:$0xff] (!%p1921_p3)  ;;  %v1939_v38 = vld [vmem:[#allocation3 + $0x48] sm:$0xff] (!%p1921_p3)  ;;  %v1940_v41 = vld [vmem:[#allocation3 + $0x50] sm:$0xff] (!%p1921_p3) }
 0x5c7   : > { %2610 = vmatpush3.bf16.msra.mxu0 (!%p1921_p3), %v1927_v56  ;;  %2625 = vmatprep.mubr.msk.bf16.mxu0 (!%p1921_p3), %vm2963_vm1, %v2962_v36  ;;  %v1930_v42 = vld [vmem:[#allocation3 + $0x18] sm:$0xff] (!%p1921_p3)  ;;  %v1931_v44 = vld [vmem:[#allocation3 + $0x20] sm:$0xff] (!%p1921_p3)  ;;  %v1932_v46 = vld [vmem:[#allocation3 + $0x28] sm:$0xff] (!%p1921_p3) }
 0x5c8   : > { %2611 = vmatprep.subr.bf16.mxu0 (!%p1921_p3), %v2962_v36  ;;  %2590 = vmatpush3.bf16.msra.mxu1 (!%p1921_p3), %v1938_v34  ;;  %v1941_v43 = vld [vmem:[#allocation3 + $0x58] sm:$0xff] (!%p1921_p3)  ;;  %v1942_v45 = vld [vmem:[#allocation3 + $0x60] sm:$0xff] (!%p1921_p3)  ;;  %v1943_v47 = vld [vmem:[#allocation3 + $0x68] sm:$0xff] (!%p1921_p3) }
 0x5c9   : > { %2591 = vmatprep.subr.bf16.mxu1 (!%p1921_p3), %v2962_v36  ;;  %2605 = vmatprep.mubr.msk.bf16.mxu1 (!%p1921_p3), %vm2963_vm1, %v2962_v36  ;;  %v1933_v48 = vld [vmem:[#allocation3 + $0x30] sm:$0xff] (!%p1921_p3)  ;;  %v1925_v50 = vld [vmem:[#allocation4] sm:$0x1] (!%p1921_p3)  ;;  %v1934_v51 = vld [vmem:[#allocation3 + $0x38] sm:$0xff] (!%p1921_p3) }
 0x5ca   : > { %v1944_v30 = vld [vmem:[#allocation3 + $0x70] sm:$0xff] (!%p1921_p3)  ;;  %v1936_v31 = vld [vmem:[#allocation4 + $0x1] sm:$0x1] (!%p1921_p3)  ;;  %v1945_v49 = vld [vmem:[#allocation3 + $0x78] sm:$0xff] (!%p1921_p3)  ;;  %v1926_v54 = vpack.c.bf16 (!%p1921_p3), %v1925_v50, %v1925_v50 }
 0x5cb   : > { %2612 = vmatpush3.bf16.msra.mxu0 (!%p1921_p3), %v1928_v37  ;;  %v1937_v55 = vpack.c.bf16 (!%p1921_p3), %v1936_v31, %v1936_v31  ;;  %v2029_v57 = vld [vmem:[#allocation3 + $0x80] sm:$0xff] (!%p1921_p3)  ;;  %v2846_v58 = vld [vmem:[%s3591_s9] sm:$0xff] (!%p1921_p3)   ;;  %v2847_v52 = vld [vmem:[%s3591_s9 + $0x8] sm:$0xff] (!%p1921_p3)  }
 0x5cc   : > { %2613 = vmatprep.subr.bf16.mxu0 (!%p1921_p3), %v2962_v36  ;;  %2592 = vmatpush3.bf16.msra.mxu1 (!%p1921_p3), %v1939_v38  ;;  %v2030_v39 = vld [vmem:[#allocation3 + $0x88] sm:$0xff] (!%p1921_p3)  ;;  %v2031_v53 = vld [vmem:[#allocation3 + $0x90] sm:$0xff] (!%p1921_p3)  ;;  %v2848_v35 = vld [vmem:[%s3591_s9 + $0x10] sm:$0xff] (!%p1921_p3)  }
 0x5cd   : > { %2593 = vmatprep.subr.bf16.mxu1 %v2962_v36  ;;  %v2032_v61 = vld [vmem:[#allocation3 + $0x98] sm:$0xff]  ;;  %v2849_v62 = vld [vmem:[%s3591_s9 + $0x18] sm:$0xff]   ;;  %v2850_v0 = vld [vmem:[%s3591_s9 + $0x20] sm:$0xff]  }
 0x5ce   : > { %v2033_v63 = vld [vmem:[#allocation3 + $0xa0] sm:$0xff]  ;;  %v2034_v3 = vld [vmem:[#allocation3 + $0xa8] sm:$0xff]  ;;  %v2851_v4 = vld [vmem:[%s3591_s9 + $0x28] sm:$0xff]  }
 0x5cf   : > { %2614 = vmatpush3.bf16.msra.mxu0 %v1929_v40  ;;  %v2035_v27 = vld [vmem:[#allocation3 + $0xb0] sm:$0xff]  ;;  %v2027_v5 = vld [vmem:[#allocation4 + $0x2] sm:$0x1]  ;;  %v2036_v6 = vld [vmem:[#allocation3 + $0xb8] sm:$0xff] }
 0x5d0   : > { %2615 = vmatprep.subr.bf16.mxu0 %v2962_v36  ;;  %2594 = vmatpush3.bf16.msra.mxu1 %v1940_v41  ;;  %v2028_v7 = vpack.c.bf16 %v2027_v5, %v2027_v5  ;;  %v2852_v8 = vld [vmem:[%s3591_s9 + $0x30] sm:$0xff]   ;;  %v2853_v9 = vld [vmem:[%s3591_s9 + $0x38] sm:$0xff]   ;;  %v2184_v21 = vld [vmem:[%s3610_s19] sm:$0x1] }
 0x5d1   : > { %2595 = vmatprep.subr.bf16.mxu1 %v2962_v36 }
 0x5d3   : > { %2616 = vmatpush3.bf16.msra.mxu0 %v1930_v42 }
 0x5d4   : > { %2617 = vmatprep.subr.bf16.mxu0 %v2962_v36  ;;  %2596 = vmatpush3.bf16.msra.mxu1 %v1941_v43 }
 0x5d5   : > { %2597 = vmatprep.subr.bf16.mxu1 %v2962_v36 }
 0x5d7   : > { %2618 = vmatpush3.bf16.msra.mxu0 %v1931_v44 }
 0x5d8   : > { %2619 = vmatprep.subr.bf16.mxu0 %v2962_v36  ;;  %2598 = vmatpush3.bf16.msra.mxu1 %v1942_v45 }
 0x5d9   : > { %2599 = vmatprep.subr.bf16.mxu1 %v2962_v36 }
 0x5db   : > { %2620 = vmatpush3.bf16.msra.mxu0 %v1932_v46 }
 0x5dc   : > { %2621 = vmatprep.subr.bf16.mxu0 %v2962_v36  ;;  %2600 = vmatpush3.bf16.msra.mxu1 %v1943_v47 }
 0x5dd   : > { %2601 = vmatprep.subr.bf16.mxu1 %v2962_v36 }
 0x5df   : > { %2622 = vmatpush3.bf16.msra.mxu0 %v1933_v48 }
 0x5e0   : > { %2623 = vmatprep.subr.bf16.mxu0 %v2962_v36  ;;  %2602 = vmatpush3.bf16.msra.mxu1 %v1944_v30 }
 0x5e1   : > { %2603 = vmatprep.subr.bf16.mxu1 %v2962_v36 }
 0x5e3   : > { %2624 = vmatpush3.bf16.msra.mxu0 %v1934_v51 }
 0x5e4   : > { %2629 = vmatprep.subr.bf16.mxu0 %v2962_v36  ;;  %2604 = vmatpush3.bf16.msra.mxu1 %v1945_v49 }
 0x5e5   : > { %2649 = vmatprep.subr.bf16.mxu1 %v2962_v36 }
 0x5e6   : > { %2626 = vmatmul.mubr.bf16.vlgmr.msra.gmra.mrb[0].mxu0 %v1926_v54 }
 0x5e7   : > { %2630 = vmatpush3.bf16.msra.mxu0 %v2029_v57  ;;  %2606 = vmatmul.mubr.bf16.vlgmr.msra.gmra.mrb[0].mxu1 %v1937_v55 }
 0x5e8   : > { %2631 = vmatprep.subr.bf16.mxu0 %v2962_v36  ;;  %2645 = vmatprep.mubr.msk.bf16.mxu0 %vm2963_vm1, %v2962_v36 }
 0x5e9   : > { %2650 = vmatpush3.bf16.msra.mxu1 %v2846_v58  ;;  %2665 = vmatprep.mubr.msk.bf16.mxu1 %vm2963_vm1, %v2962_v36 }
 0x5ea   : > { %2651 = vmatprep.subr.bf16.mxu1 %v2962_v36 }
 0x5eb   : > { %2632 = vmatpush3.bf16.msra.mxu0 %v2030_v39 }
 0x5ec   : > { %2633 = vmatprep.subr.bf16.mxu0 %v2962_v36 }
 0x5ed   : > { %2652 = vmatpush3.bf16.msra.mxu1 %v2847_v52 }
 0x5ee   : > { %2653 = vmatprep.subr.bf16.mxu1 %v2962_v36 }
 0x5ef   : > { %2634 = vmatpush3.bf16.msra.mxu0 %v2031_v53 }
 0x5f0   : > { %2635 = vmatprep.subr.bf16.mxu0 %v2962_v36 }
 0x5f1   : > { %2654 = vmatpush3.bf16.msra.mxu1 %v2848_v35 }
 0x5f2   : > { %2655 = vmatprep.subr.bf16.mxu1 %v2962_v36 }
 0x5f3   : > { %2636 = vmatpush3.bf16.msra.mxu0 %v2032_v61 }
 0x5f4   : > { %2637 = vmatprep.subr.bf16.mxu0 %v2962_v36 }
 0x5f5   : > { %2656 = vmatpush3.bf16.msra.mxu1 %v2849_v62 }
 0x5f6   : > { %2657 = vmatprep.subr.bf16.mxu1 %v2962_v36 }
 0x5f7   : > { %2638 = vmatpush3.bf16.msra.mxu0 %v2033_v63 }
 0x5f8   : > { %2639 = vmatprep.subr.bf16.mxu0 %v2962_v36 }
 0x5f9   : > { %2658 = vmatpush3.bf16.msra.mxu1 %v2850_v0 }
 0x5fa   : > { %2659 = vmatprep.subr.bf16.mxu1 %v2962_v36 }
 0x5fb   : > { %2640 = vmatpush3.bf16.msra.mxu0 %v2034_v3 }
 0x5fc   : > { %2641 = vmatprep.subr.bf16.mxu0 %v2962_v36 }
 0x5fd   : > { %2660 = vmatpush3.bf16.msra.mxu1 %v2851_v4 }
 0x5fe   : > { %2661 = vmatprep.subr.bf16.mxu1 %v2962_v36 }
 0x5ff   : > { %2642 = vmatpush3.bf16.msra.mxu0 %v2035_v27 }
 0x600   : > { %2643 = vmatprep.subr.bf16.mxu0 %v2962_v36 }
 0x601   : > { %2662 = vmatpush3.bf16.msra.mxu1 %v2852_v8 }
 0x602   : > { %2663 = vmatprep.subr.bf16.mxu1 %v2962_v36 }
 0x603   : > { %2644 = vmatpush3.bf16.msra.mxu0 %v2036_v6 }
 0x605   : > { %2664 = vmatpush3.bf16.msra.mxu1 %v2853_v9 }
 0x606   : > { %2646 = vmatmul.mubr.bf16.vlgmr.msra.gmra.mrb[0].mxu0 %v2028_v7 }
 0x6ba   : > { %v1980_v10 = vpop.f32.mrb[0].mxu1 }
 0x6bb   : > { %v2607_v59 = vpop.f32.mrb[1].mxu1 }
 0x6bc   : > { %v1983_v60 = vpop.f32.mrb[2].mxu1 }
 0x6bd   : > { %v2608_v11 = vpop.f32.mrb[3].mxu1 }
 0x6d9   : > { %v2071_v12 = vpop.f32.mrb[0].mxu0 }
 0x6da   : > { %v2717_v13 = vadd.f32 %v2071_v12, %v1980_v10  ;;  %v2647_v14 = vpop.f32.mrb[1].mxu0 }
 0x6db   : > { %v2074_v15 = vpop.f32.mrb[2].mxu0 }
 0x6dc   : > { %v2078_v16 = vpack.c.bf16 %v2717_v13, %v2717_v13  ;;  %v2648_v17 = vpop.f32.mrb[3].mxu0 }
 0x6de   : > { %2666 = vmatmul.mubr.bf16.vlgmr.msra.gmra.mrb[4].mxu1 %v2078_v16 }
 0x7b1   : > { %v2177_v18 = vpop.f32.mrb[4].mxu1 }
 0x7b2   : > { %v2183_v22 = vmul.f32 0.0033333334, %v2177_v18  ;;  %v2667_v19 = vpop.f32.mrb[5].mxu1 }
 0x7b3   : > { %v2180_v20 = vpop.f32.mrb[6].mxu1 }
 0x7b4   : > { %v2185_v1 = vadd.f32 %v2184_v21, %v2183_v22  ;;  %v2668_v2 = vpop.f32.mrb[7].mxu1 }
 0x7b6   : > { %2186 = vst [vmem:[#allocation7] sm:$0x1] %v2185_v1 }
 0x7b7 PF: > { %s3611_s20 = sadd.s32 4294967295, %s2954_s25   ;;  %s2964_s28 = smov [#allocation7]  }
 0x7b8   : > { %p3529_p4 = scmp.eq.s32.totalorder %s3611_s20, 17  ;;  %s2194_s11 = sshll.u32 %s2964_s28, 4  ;;  %s2195_s11 = int_to_ptr.vmem [resolvable:$true] %s2194_s11 }
 0x7b9   : > { %s2854_s23 = scalar_lea.vmem %s2195_s11, 16  ;;  %s2860_s26 = scalar_lea.vmem %s2195_s11, 32 }
 0x7ba   : > { %p2855_p5 = scmp.ne.s32.totalorder %s2195_s11, %s2854_s23  ;;  %p2861_p8 = scmp.lt.s32.totalorder %s2195_s11, %s2195_s11 }
 0x7bb   : > { %p2862_p9 = scmp.lt.s32.totalorder %s2860_s26, %s2854_s23 }
 0x7bc   : > { %p2856_p6 = pnand %p2855_p5, %p3529_p4 }
 0x7bd   : > { %p2863_p10 = por %p2862_p9, %p2861_p8 }
 0x7be   : > { %p2857_p7 = pneg %p2856_p6 }
 0x7c0   : > { %p2864_p11 = pnand %p2863_p10, %p2857_p7 }
 0x7c2   : > { %2867 = shalt.err (!%p2864_p11)
}
 0x7c3   : > { %s3613_s30 = sld [smem:[#allocation17_spill]] }
 0x7c9   : > { %s2868_s27 = scalar_lea.hbm %s3613_s30, 16 }
 0x7ca   : > { %p2869_p12 = scmp.ne.s32.totalorder %s3613_s30, %s2868_s27  ;;  %p2874_p1 = scmp.lt.u32.totalorder %s2868_s27, %s3613_s30 }
 0x7cc   : > { %p2870_p13 = pnand %p2869_p12, %p3529_p4 }
 0x7ce   : > { %p2871_p0 = pneg %p2870_p13 }
 0x7d0   : > { %p2876_p2 = pnand %p2874_p1, %p2871_p0 }
 0x7d2   : > { %2879 = shalt.err (!%p2876_p2)
}
 0x7d3   : > { %2724 = dma.vmem_to_hbm [thread:$0]  (%p3529_p4), %s2195_s11, 16, %s3613_s30, [#allocation8]  }
 0x7d4   : > { %2917 = dma.done.wait (%p3529_p4), [#allocation8], 16  }
 0x7d5   : > { %2919 = vsyncadd (%p3529_p4), [#allocation8], 4294967280 }
 0x7d6 PF: > { %s22_s25 = sadd.s32 1, %s2954_s25   ;;  %s3614_s20 = sld [smem:[#allocation10_spill]] }
 0x7d7   : > { %p19_p3 = scmp.ge.s32.totalorder %s22_s25, 20   ;;  %s3615_s21 = sld [smem:[#allocation11_spill]] }
 0x7d8   : > { %s3616_s24 = sld [smem:[#allocation12_spill]]  ;;  %s3617_s23 = sld [smem:[#allocation13_spill]] }
 0x7d9   : > { %s3618_s28 = sld [smem:[#allocation14_spill]]  ;;  %s3619_s17 = smov %s2926_s18 }
 0x7da   : > { %s3620_s18 = smov %s3091_s15  ;;  %s3621_s19 = smov %s2942_s22 }
 0x7db   :  { %21 = sbr.rel (!%p19_p3) target bundleno = 9 (0x9), region = 192 }
 0x7de   : > { %s3622_s22 = smov %s3616_s24 }
 0x7df   : > { %s3623_s24 = smov %s3618_s28 }
 0x7e2   :  { %2207 = vsyncpa [#allocation8], 1 }
 0x7e3   :  { %2209 = vsyncpa [#allocation8 + $0x1], 1 }

</bundles_post_ra>
